<compile_context>
chip_gen: v5e
topology: v5e:2x2
jax: 0.10.0
libtpu: 0.0.40
codegen_flags: <defaults>
</compile_context>

<pallas_src>
import numpy as np
import jax
import jax.numpy as jnp
from jax import lax
from jax.experimental import pallas as pl
from jax.experimental.pallas import tpu as pltpu


def _disc_kernel(patches_ref, cw_ref, cb_ref, hwk_ref, hbk_ref, fck_ref, fbk_ref,
                 feat_ref, score_ref, pred_ref):
    """One batch element per grid step.  Everything is 2-D and matmul-shaped.

    patches_ref : (R, K)        im2col patches, rows ordered (w major, d minor)
    cw_ref      : (K, C)        flattened conv3d weight
    cb_ref      : (1, C)        conv bias (per out-channel)
    hwk_ref     : (F*d, R)      kron(highway_w, I_d)
    hbk_ref     : (F*d, 1)      highway bias, repeated over d
    fck_ref     : (NC*d, F*d)   kron(fc_w, I_d)
    fbk_ref     : (NC*d, 1)     fc bias, repeated over d
    feat_ref    : (F*d, C)      highway output (dropout = identity)
    score_ref   : (NC*d, C)     fc output
    pred_ref    : (NC*d, C)     log_softmax(score) over the channel axis C (lanes)
    """
    # ---- Conv3d as im2col matmul + bias + ReLU (MXU) -------------------------
    conv = jnp.dot(patches_ref[...], cw_ref[...],
                   preferred_element_type=jnp.float32,
                   precision=lax.Precision.HIGHEST)
    conv = jnp.maximum(conv + cb_ref[...], 0.0)            # (R, C), rows = (w, d)

    # ---- Highway Linear as a single matmul (MXU) -----------------------------
    hwy = jnp.dot(hwk_ref[...], conv,
                  preferred_element_type=jnp.float32,
                  precision=lax.Precision.HIGHEST) + hbk_ref[...]   # (F*d, C)

    # Highway gate.  exp() goes to the EUP; exact divide kept (approx reciprocal
    # would cost ~1e-3 relative error and break the 1e-4 check).
    sig = 1.0 / (1.0 + jnp.exp(-hwy))
    feat = sig * jnp.maximum(hwy, 0.0) + (1.0 - sig) * conv          # rows (j,d) ~ (w,d)
    feat_ref[...] = feat                                             # dropout -> identity

    # ---- fc Linear as a single matmul (MXU) ----------------------------------
    score = jnp.dot(fck_ref[...], feat,
                    preferred_element_type=jnp.float32,
                    precision=lax.Precision.HIGHEST) + fbk_ref[...]  # (NC*d, C)
    score_ref[...] = score

    # ---- log_softmax over the channel axis C (lane reduction, EUP exp/log) ---
    m = jnp.max(score, axis=1, keepdims=True)
    z = score - m
    lse = jnp.log(jnp.sum(jnp.exp(z), axis=1, keepdims=True))
    pred_ref[...] = z - lse


def discriminator_l2_forward(tokens, params):
    """tokens: int32 (B, P, V) — batch x paragraph-length x vector_data (=30)."""
    # Embedding lookup (gather) — plain JAX glue.
    x = jnp.take(params["emb"], tokens, axis=0).astype(jnp.float32)   # (B, P, V, E)

    conv_w = params["conv_w"]                                         # (C, f, V, vl)
    B, P, V, E = x.shape
    C, f, _, vl = conv_w.shape
    n_cls = params["fc_w"].shape[0]
    F = params["highway_w"].shape[0]
    d_out = P - f + 1
    w_out = E - vl + 1
    assert w_out == params["highway_w"].shape[1], \
        "highway Linear in_features must equal conv W_out"

    R = w_out * d_out          # im2col rows per batch element (w major, d minor)
    K = f * V * vl             # im2col contraction length

    # ---- im2col patches (XLA, outside the kernel): rows (w, d), cols (df, h, we)
    stk = jnp.stack(
        [jnp.stack([x[:, df:df + d_out, :, we:we + w_out] for we in range(vl)], axis=0)
         for df in range(f)], axis=0)                       # (f, vl, B, d_out, V, w_out)
    patches = jnp.transpose(stk, (2, 5, 3, 0, 4, 1))        # (B, w_out, d_out, f, V, vl)
    patches = patches.reshape(B, R, K)

    # ---- weights pre-laid-out in the wrapper (zero in-kernel slicing/reshaping)
    cw_mat = conv_w.reshape(C, K).T                          # (K, C)
    cb_row = params["conv_b"].reshape(1, C)
    eye_d = jnp.eye(d_out, dtype=jnp.float32)
    hw_kron = jnp.kron(params["highway_w"], eye_d)           # (F*d, R)
    hb_col = jnp.repeat(params["highway_b"], d_out).reshape(F * d_out, 1)
    fc_kron = jnp.kron(params["fc_w"], eye_d)                # (NC*d, F*d)
    fb_col = jnp.repeat(params["fc_b"], d_out).reshape(n_cls * d_out, 1)

    out_shapes = (
        jax.ShapeDtypeStruct((B, F * d_out, C), jnp.float32),      # feature (kernel layout)
        jax.ShapeDtypeStruct((B, n_cls * d_out, C), jnp.float32),  # score
        jax.ShapeDtypeStruct((B, n_cls * d_out, C), jnp.float32),  # pred (log-softmax)
    )

    flops = 2 * B * (R * K * C + (F * d_out) * R * C
                     + (n_cls * d_out) * (F * d_out) * C)
    transcendentals = B * (F * d_out * C + 2 * n_cls * d_out * C)
    bytes_accessed = 4 * (B * R * K + K * C + C + F * d_out * R + F * d_out
                          + n_cls * d_out * F * d_out + n_cls * d_out
                          + B * F * d_out * C + 2 * B * n_cls * d_out * C)

    feat_k, score_k, pred_k = pl.pallas_call(
        _disc_kernel,
        out_shape=out_shapes,
        grid=(B,),
        in_specs=[
            pl.BlockSpec((None, R, K), lambda b: (b, 0, 0)),             # patches (per-b)
            pl.BlockSpec((K, C), lambda b: (0, 0)),                      # conv weight
            pl.BlockSpec((1, C), lambda b: (0, 0)),                      # conv bias
            pl.BlockSpec((F * d_out, R), lambda b: (0, 0)),              # highway kron
            pl.BlockSpec((F * d_out, 1), lambda b: (0, 0)),              # highway bias
            pl.BlockSpec((n_cls * d_out, F * d_out), lambda b: (0, 0)),  # fc kron
            pl.BlockSpec((n_cls * d_out, 1), lambda b: (0, 0)),          # fc bias
        ],
        out_specs=(
            pl.BlockSpec((None, F * d_out, C), lambda b: (b, 0, 0)),
            pl.BlockSpec((None, n_cls * d_out, C), lambda b: (b, 0, 0)),
            pl.BlockSpec((None, n_cls * d_out, C), lambda b: (b, 0, 0)),
        ),
        compiler_params=pltpu.CompilerParams(
            dimension_semantics=("parallel",)),      # shard batch across v7x's 2 TCs
        cost_estimate=pl.CostEstimate(flops=flops,
                                      transcendentals=transcendentals,
                                      bytes_accessed=bytes_accessed),
    )(patches, cw_mat, cb_row, hw_kron, hb_col, fc_kron, fb_col)

    # Back to PyTorch's axis order, outside the kernel (pure XLA layout work).
    feature = jnp.transpose(feat_k.reshape(B, F, d_out, C), (0, 3, 2, 1))     # (B,C,d,F)
    score = jnp.transpose(score_k.reshape(B, n_cls, d_out, C), (0, 3, 2, 1))  # (B,C,d,NC)
    pred = jnp.transpose(pred_k.reshape(B, n_cls, d_out, C), (0, 3, 2, 1))    # (B,C,d,NC)
    return {"pred": pred, "feature": feature, "score": score}


def init_params(key, *, vocab_size, dis_emb_dim, filter_sizes, num_filters, num_classes):
    assert len(set(filter_sizes)) == 1, "torch.cat(convs, 1) requires equal filter sizes"
    n_total = sum(num_filters)
    vec_length = n_total
    n_keys = 1 + len(filter_sizes) + 4
    keys = jax.random.split(key, n_keys)

    emb = 0.1 * jax.random.normal(keys[0], (vocab_size + 1, dis_emb_dim), jnp.float32)

    conv_ws, conv_bs = [], []
    for i, (fs, nf) in enumerate(zip(filter_sizes, num_filters)):
        kw, kb = jax.random.split(keys[1 + i])
        # PyTorch Conv3d weight shape: (out, in=1, f_size, 30, vec_length)
        w = 0.1 * jax.random.normal(kw, (nf, 1, fs, 30, vec_length), jnp.float32)
        b = 0.1 * jax.random.normal(kb, (nf,), jnp.float32)
        conv_ws.append(w[:, 0])                 # drop in-channel
        conv_bs.append(b)
    conv_w = jnp.concatenate(conv_ws, axis=0)   # (C_total, f, 30, vec_length)
    conv_b = jnp.concatenate(conv_bs, axis=0)   # (C_total,)

    base = 1 + len(filter_sizes)
    highway_w = 0.1 * jax.random.normal(keys[base + 0], (n_total, n_total), jnp.float32)
    highway_b = 0.1 * jax.random.normal(keys[base + 1], (n_total,), jnp.float32)
    fc_w = 0.1 * jax.random.normal(keys[base + 2], (num_classes, n_total), jnp.float32)
    fc_b = 0.1 * jax.random.normal(keys[base + 3], (num_classes,), jnp.float32)

    return dict(emb=emb, conv_w=conv_w, conv_b=conv_b,
                highway_w=highway_w, highway_b=highway_b,
                fc_w=fc_w, fc_b=fc_b)


def reference_forward(tokens, params):
    """Pure-JAX reference mirroring the PyTorch forward."""
    emb = jnp.take(params["emb"], tokens, axis=0).astype(jnp.float32)
    x5 = emb[:, None]                                   # (B, 1, P, V, E)
    w5 = params["conv_w"][:, None]                      # (C, 1, f, V, vl)
    conv = lax.conv_general_dilated(
        x5, w5, window_strides=(1, 1, 1), padding="VALID",
        dimension_numbers=("NCDHW", "OIDHW", "NCDHW"),
        precision=lax.Precision.HIGHEST)                # (B, C, D_out, 1, W_out)
    conv = conv + params["conv_b"][None, :, None, None, None]
    conv = jnp.maximum(conv, 0.0)[:, :, :, 0, :]        # squeeze(3); H_out == 1 since V == 30
    pred = conv
    hwy = jnp.einsum("bcdw,jw->bcdj", pred, params["highway_w"],
                     precision=lax.Precision.HIGHEST) + params["highway_b"]
    sig = jax.nn.sigmoid(hwy)
    features = sig * jnp.maximum(hwy, 0.0) + (1.0 - sig) * pred
    score = jnp.einsum("bcdw,jw->bcdj", features, params["fc_w"],
                       precision=lax.Precision.HIGHEST) + params["fc_b"]
    logp = jax.nn.log_softmax(score, axis=1)
    return {"pred": logp, "feature": features, "score": score}


if __name__ == "__main__":
    # Small hyper-parameters consistent with the module's forward pass.
    seq_len = 5            # paragraph length in sentences (P)
    num_classes = 2
    vocab_size = 20
    dis_emb_dim = 15       # so W_out = 15 - 8 + 1 = 8 = num_filters_total
    filter_sizes = (3, 3)  # must all be equal (torch.cat over conv outputs)
    num_filters = (3, 5)   # num_filters_total = 8 = vec_length
    sentence_len = 30      # "vector_data" axis; fixed to 30 by the conv kernel height
    batch = 2

    key = jax.random.PRNGKey(0)
    k_par, k_x = jax.random.split(key)
    params = init_params(k_par, vocab_size=vocab_size, dis_emb_dim=dis_emb_dim,
                         filter_sizes=filter_sizes, num_filters=num_filters,
                         num_classes=num_classes)
    x = jax.random.randint(k_x, (batch, seq_len, sentence_len),
                           0, vocab_size + 1, dtype=jnp.int32)

    out = jax.jit(discriminator_l2_forward)(x, params)
    jax.block_until_ready(out)

    ref = reference_forward(x, params)
    for name in ("pred", "feature", "score"):
        np.testing.assert_allclose(np.asarray(out[name]), np.asarray(ref[name]),
                                   rtol=1e-4, atol=1e-4)

    print("KERNEL_OK")
</pallas_src>

<mosaic_0001>
module attributes {stable_mosaic.version = 11 : i64} {
  func.func @_disc_kernel(%arg0: i32, %arg1: memref<1x24x720xf32, #tpu.memory_space<vmem>>, %arg2: memref<720x8xf32, #tpu.memory_space<vmem>>, %arg3: memref<1x8xf32, #tpu.memory_space<vmem>>, %arg4: memref<24x24xf32, #tpu.memory_space<vmem>>, %arg5: memref<24x1xf32, #tpu.memory_space<vmem>>, %arg6: memref<6x24xf32, #tpu.memory_space<vmem>>, %arg7: memref<6x1xf32, #tpu.memory_space<vmem>>, %arg8: memref<1x24x8xf32, #tpu.memory_space<vmem>>, %arg9: memref<1x6x8xf32, #tpu.memory_space<vmem>>, %arg10: memref<1x6x8xf32, #tpu.memory_space<vmem>>) attributes {dimension_semantics = [#tpu.dimension_semantics<parallel>], iteration_bounds = array<i64: 2>, scalar_prefetch = 0 : i64, scratch_operands = 0 : i64, tpu.core_type = #tpu.core_type<tc>, window_params = [{transform_indices = @transform_0, window_bounds = array<i64: 1, 24, 720>}, {pipeline_mode = #tpu.pipeline_mode<synchronous>, transform_indices = @transform_1, window_bounds = array<i64: 720, 8>}, {pipeline_mode = #tpu.pipeline_mode<synchronous>, transform_indices = @transform_2, window_bounds = array<i64: 1, 8>}, {pipeline_mode = #tpu.pipeline_mode<synchronous>, transform_indices = @transform_3, window_bounds = array<i64: 24, 24>}, {pipeline_mode = #tpu.pipeline_mode<synchronous>, transform_indices = @transform_4, window_bounds = array<i64: 24, 1>}, {pipeline_mode = #tpu.pipeline_mode<synchronous>, transform_indices = @transform_5, window_bounds = array<i64: 6, 24>}, {pipeline_mode = #tpu.pipeline_mode<synchronous>, transform_indices = @transform_6, window_bounds = array<i64: 6, 1>}, {transform_indices = @transform_7, window_bounds = array<i64: 1, 24, 8>}, {transform_indices = @transform_8, window_bounds = array<i64: 1, 6, 8>}, {transform_indices = @transform_9, window_bounds = array<i64: 1, 6, 8>}]} {
    %c0 = arith.constant 0 : index
    %c0_0 = arith.constant 0 : index
    %c0_1 = arith.constant 0 : index
    %0 = vector.load %arg1[%c0, %c0_0, %c0_1] : memref<1x24x720xf32, #tpu.memory_space<vmem>>, vector<1x24x720xf32>
    %1 = vector.shape_cast %0 : vector<1x24x720xf32> to vector<24x720xf32>
    %c0_2 = arith.constant 0 : index
    %c0_3 = arith.constant 0 : index
    %2 = vector.load %arg2[%c0_2, %c0_3] : memref<720x8xf32, #tpu.memory_space<vmem>>, vector<720x8xf32>
    %cst = arith.constant dense<0.000000e+00> : vector<24x8xf32>
    %3 = tpu.matmul %1, %2, %cst {dimension_numbers = #tpu.dot_dimension_numbers<[1], [0], [0], [1], [0, 0, 1, 1], [], []>, precision = #tpu.contract_precision<fp32>} : vector<24x720xf32>, vector<720x8xf32>, vector<24x8xf32> -> vector<24x8xf32>
    %c0_4 = arith.constant 0 : index
    %c0_5 = arith.constant 0 : index
    %4 = vector.load %arg3[%c0_4, %c0_5] : memref<1x8xf32, #tpu.memory_space<vmem>>, vector<1x8xf32>
    %5 = vector.broadcast %4 : vector<1x8xf32> to vector<24x8xf32>
    %6 = arith.addf %3, %5 : vector<24x8xf32>
    %cst_6 = arith.constant 0.000000e+00 : f32
    %7 = vector.broadcast %cst_6 : f32 to vector<24x8xf32>
    %8 = arith.maximumf %6, %7 : vector<24x8xf32>
    %c0_7 = arith.constant 0 : index
    %c0_8 = arith.constant 0 : index
    %9 = vector.load %arg4[%c0_7, %c0_8] : memref<24x24xf32, #tpu.memory_space<vmem>>, vector<24x24xf32>
    %cst_9 = arith.constant dense<0.000000e+00> : vector<24x8xf32>
    %10 = tpu.matmul %9, %8, %cst_9 {dimension_numbers = #tpu.dot_dimension_numbers<[1], [0], [0], [1], [0, 0, 1, 1], [], []>, precision = #tpu.contract_precision<fp32>} : vector<24x24xf32>, vector<24x8xf32>, vector<24x8xf32> -> vector<24x8xf32>
    %c0_10 = arith.constant 0 : index
    %c0_11 = arith.constant 0 : index
    %11 = vector.load %arg5[%c0_10, %c0_11] : memref<24x1xf32, #tpu.memory_space<vmem>>, vector<24x1xf32>
    %12 = vector.broadcast %11 : vector<24x1xf32> to vector<24x8xf32>
    %13 = arith.addf %10, %12 : vector<24x8xf32>
    %cst_12 = arith.constant 0.000000e+00 : f32
    %14 = vector.broadcast %cst_12 : f32 to vector<24x8xf32>
    %15 = arith.subf %14, %13 : vector<24x8xf32>
    %16 = math.exp %15 : vector<24x8xf32>
    %cst_13 = arith.constant 1.000000e+00 : f32
    %17 = vector.broadcast %cst_13 : f32 to vector<24x8xf32>
    %18 = arith.addf %17, %16 : vector<24x8xf32>
    %cst_14 = arith.constant 1.000000e+00 : f32
    %19 = vector.broadcast %cst_14 : f32 to vector<24x8xf32>
    %20 = arith.divf %19, %18 : vector<24x8xf32>
    %cst_15 = arith.constant 0.000000e+00 : f32
    %21 = vector.broadcast %cst_15 : f32 to vector<24x8xf32>
    %22 = arith.maximumf %13, %21 : vector<24x8xf32>
    %23 = arith.mulf %20, %22 : vector<24x8xf32>
    %cst_16 = arith.constant 1.000000e+00 : f32
    %24 = vector.broadcast %cst_16 : f32 to vector<24x8xf32>
    %25 = arith.subf %24, %20 : vector<24x8xf32>
    %26 = arith.mulf %25, %8 : vector<24x8xf32>
    %27 = arith.addf %23, %26 : vector<24x8xf32>
    %c0_17 = arith.constant 0 : index
    %c0_18 = arith.constant 0 : index
    %c0_19 = arith.constant 0 : index
    %28 = vector.load %arg8[%c0_17, %c0_18, %c0_19] : memref<1x24x8xf32, #tpu.memory_space<vmem>>, vector<1x24x8xf32>
    %29 = vector.shape_cast %28 : vector<1x24x8xf32> to vector<24x8xf32>
    %30 = vector.shape_cast %27 : vector<24x8xf32> to vector<1x24x8xf32>
    tpu.vector_store %arg8[%c0_17, %c0_18, %c0_19], %30 {strides = array<i32>} : memref<1x24x8xf32, #tpu.memory_space<vmem>>, vector<1x24x8xf32>,
    %c0_20 = arith.constant 0 : index
    %c0_21 = arith.constant 0 : index
    %31 = vector.load %arg6[%c0_20, %c0_21] : memref<6x24xf32, #tpu.memory_space<vmem>>, vector<6x24xf32>
    %cst_22 = arith.constant dense<0.000000e+00> : vector<6x8xf32>
    %32 = tpu.matmul %31, %27, %cst_22 {dimension_numbers = #tpu.dot_dimension_numbers<[1], [0], [0], [1], [0, 0, 1, 1], [], []>, precision = #tpu.contract_precision<fp32>} : vector<6x24xf32>, vector<24x8xf32>, vector<6x8xf32> -> vector<6x8xf32>
    %c0_23 = arith.constant 0 : index
    %c0_24 = arith.constant 0 : index
    %33 = vector.load %arg7[%c0_23, %c0_24] : memref<6x1xf32, #tpu.memory_space<vmem>>, vector<6x1xf32>
    %34 = vector.broadcast %33 : vector<6x1xf32> to vector<6x8xf32>
    %35 = arith.addf %32, %34 : vector<6x8xf32>
    %c0_25 = arith.constant 0 : index
    %c0_26 = arith.constant 0 : index
    %c0_27 = arith.constant 0 : index
    %36 = vector.load %arg9[%c0_25, %c0_26, %c0_27] : memref<1x6x8xf32, #tpu.memory_space<vmem>>, vector<1x6x8xf32>
    %37 = vector.shape_cast %36 : vector<1x6x8xf32> to vector<6x8xf32>
    %38 = vector.shape_cast %35 : vector<6x8xf32> to vector<1x6x8xf32>
    tpu.vector_store %arg9[%c0_25, %c0_26, %c0_27], %38 {strides = array<i32>} : memref<1x6x8xf32, #tpu.memory_space<vmem>>, vector<1x6x8xf32>,
    %cst_28 = arith.constant dense<0xFF800000> : vector<6xf32>
    %39 = vector.multi_reduction <maximumf>, %35, %cst_28 [1] : vector<6x8xf32> to vector<6xf32>
    %40 = vector.shape_cast %39 : vector<6xf32> to vector<6x1xf32>
    %41 = vector.broadcast %40 : vector<6x1xf32> to vector<6x8xf32>
    %42 = arith.subf %35, %41 : vector<6x8xf32>
    %43 = math.exp %42 : vector<6x8xf32>
    %cst_29 = arith.constant dense<0.000000e+00> : vector<6xf32>
    %44 = vector.multi_reduction <add>, %43, %cst_29 [1] : vector<6x8xf32> to vector<6xf32>
    %45 = vector.shape_cast %44 : vector<6xf32> to vector<6x1xf32>
    %46 = math.log %45 : vector<6x1xf32>
    %47 = vector.broadcast %46 : vector<6x1xf32> to vector<6x8xf32>
    %48 = arith.subf %42, %47 : vector<6x8xf32>
    %c0_30 = arith.constant 0 : index
    %c0_31 = arith.constant 0 : index
    %c0_32 = arith.constant 0 : index
    %49 = vector.load %arg10[%c0_30, %c0_31, %c0_32] : memref<1x6x8xf32, #tpu.memory_space<vmem>>, vector<1x6x8xf32>
    %50 = vector.shape_cast %49 : vector<1x6x8xf32> to vector<6x8xf32>
    %51 = vector.shape_cast %48 : vector<6x8xf32> to vector<1x6x8xf32>
    tpu.vector_store %arg10[%c0_30, %c0_31, %c0_32], %51 {strides = array<i32>} : memref<1x6x8xf32, #tpu.memory_space<vmem>>, vector<1x6x8xf32>,
    return
  }
  func.func @transform_0(%arg0: i32) -> (i32, i32, i32) {
    %c0_i32 = arith.constant 0 : i32
    %c0_i32_0 = arith.constant 0 : i32
    %c0_i32_1 = arith.constant 0 : i32
    return %arg0, %c0_i32, %c0_i32_0 : i32, i32, i32
  }
  func.func @transform_1(%arg0: i32) -> (i32, i32) {
    %c0_i32 = arith.constant 0 : i32
    %c0_i32_0 = arith.constant 0 : i32
    %c0_i32_1 = arith.constant 0 : i32
    return %c0_i32, %c0_i32_0 : i32, i32
  }
  func.func @transform_2(%arg0: i32) -> (i32, i32) {
    %c0_i32 = arith.constant 0 : i32
    %c0_i32_0 = arith.constant 0 : i32
    %c0_i32_1 = arith.constant 0 : i32
    return %c0_i32, %c0_i32_0 : i32, i32
  }
  func.func @transform_3(%arg0: i32) -> (i32, i32) {
    %c0_i32 = arith.constant 0 : i32
    %c0_i32_0 = arith.constant 0 : i32
    %c0_i32_1 = arith.constant 0 : i32
    return %c0_i32, %c0_i32_0 : i32, i32
  }
  func.func @transform_4(%arg0: i32) -> (i32, i32) {
    %c0_i32 = arith.constant 0 : i32
    %c0_i32_0 = arith.constant 0 : i32
    %c0_i32_1 = arith.constant 0 : i32
    return %c0_i32, %c0_i32_0 : i32, i32
  }
  func.func @transform_5(%arg0: i32) -> (i32, i32) {
    %c0_i32 = arith.constant 0 : i32
    %c0_i32_0 = arith.constant 0 : i32
    %c0_i32_1 = arith.constant 0 : i32
    return %c0_i32, %c0_i32_0 : i32, i32
  }
  func.func @transform_6(%arg0: i32) -> (i32, i32) {
    %c0_i32 = arith.constant 0 : i32
    %c0_i32_0 = arith.constant 0 : i32
    %c0_i32_1 = arith.constant 0 : i32
    return %c0_i32, %c0_i32_0 : i32, i32
  }
  func.func @transform_7(%arg0: i32) -> (i32, i32, i32) {
    %c0_i32 = arith.constant 0 : i32
    %c0_i32_0 = arith.constant 0 : i32
    %c0_i32_1 = arith.constant 0 : i32
    return %arg0, %c0_i32, %c0_i32_0 : i32, i32, i32
  }
  func.func @transform_8(%arg0: i32) -> (i32, i32, i32) {
    %c0_i32 = arith.constant 0 : i32
    %c0_i32_0 = arith.constant 0 : i32
    %c0_i32_1 = arith.constant 0 : i32
    return %arg0, %c0_i32, %c0_i32_0 : i32, i32, i32
  }
  func.func @transform_9(%arg0: i32) -> (i32, i32, i32) {
    %c0_i32 = arith.constant 0 : i32
    %c0_i32_0 = arith.constant 0 : i32
    %c0_i32_1 = arith.constant 0 : i32
    return %arg0, %c0_i32, %c0_i32_0 : i32, i32, i32
  }
}

</mosaic_0001>

<bundles_post_ra>
// kernel: discriminator_l2_forward.1
= control target key start
LH: loop header
LB: loop body
LE: loop exit
PB: predicated region body
PF: predicated region fallthrough
CT: control target
= control target key end

     0   :  { %s3574_s30 = smov 0   ;;  %s5719_s0 = inlined_call_operand.vmem [shape: f32[2,24,720], index: 0, kind: input, shape index: {}]   ;;  %s5720_s1 = inlined_call_operand.vmem [shape: f32[720,8], index: 1, kind: input, shape index: {}]   ;;  %s5721_s2 = inlined_call_operand.vmem [shape: f32[1,8], index: 2, kind: input, shape index: {}]   ;;  %s5722_s3 = inlined_call_operand.vmem [shape: f32[24,24], index: 3, kind: input, shape index: {}]   ;;  %s5723_s4 = inlined_call_operand.vmem [shape: f32[24,1], index: 4, kind: input, shape index: {}]   ;;  %s5724_s5 = inlined_call_operand.vmem [shape: f32[6,24], index: 5, kind: input, shape index: {}]   ;;  %s5725_s6 = inlined_call_operand.vmem [shape: f32[6,1], index: 6, kind: input, shape index: {}]   ;;  %s5726_s7 = inlined_call_operand.vmem [shape: f32[2,24,8], index: 7, kind: output, shape index: {0}]   ;;  %s5727_s8 = inlined_call_operand.vmem [shape: f32[2,6,8], index: 8, kind: output, shape index: {1}]   ;;  %s5728_s9 = inlined_call_operand.vmem [shape: f32[2,6,8], index: 9, kind: output, shape index: {2}]  }
   0x1 LB: > { %s3474_s10 = sadd.s32 4294967295, %s3521_s30   ;;  %p3478_p0 = scmp.ge.s32.totalorder %s3521_s30, 1  ;;  %s3521_s30 = sphi %s3574_s30, %s20_s30  }
   0x2   : > { %p292_p1 = scmp.lt.s32.totalorder %s3521_s30, 3 }
   0x4   : > { %p293_p2 = pnand %p3478_p0, %p292_p1 }
   0x6   : > { %296 = sbr.rel (%p293_p2) target bundleno = 1127 (0x467), region = 48 }
   0xb   : > { %v387_v0 = vld [vmem:[%s5720_s1 + $0x78] sm:$0xff]  ;;  %v386_v1 = vld [vmem:[%s5720_s1 + $0x70] sm:$0xff]  ;;  %v385_v2 = vld [vmem:[%s5720_s1 + $0x68] sm:$0xff]  ;;  %p3695_p3 = scmp.lt.s32.totalorder %s3474_s10, 1  ;;  %vm466_vm0 = vcmask 654336   ;;  %vm2840_vm1 = vcmask 195584  }
   0xc   : > { %v3591_v3 = vand.u32 4294901760, %v387_v0  ;;  %v3593_v4 = vand.u32 4294901760, %v386_v1  ;;  %v3595_v5 = vand.u32 4294901760, %v385_v2  ;;  %v384_v6 = vld [vmem:[%s5720_s1 + $0x60] sm:$0xff]  ;;  %v383_v7 = vld [vmem:[%s5720_s1 + $0x58] sm:$0xff]  ;;  %v382_v8 = vld [vmem:[%s5720_s1 + $0x50] sm:$0xff] }
   0xd   : > { %v3606_v9 = vand.u32 4294901760, %v384_v6  ;;  %v3608_v10 = vand.u32 4294901760, %v383_v7  ;;  %v3610_v11 = vand.u32 4294901760, %v382_v8  ;;  %v381_v12 = vld [vmem:[%s5720_s1 + $0x48] sm:$0xff]  ;;  %v380_v13 = vld [vmem:[%s5720_s1 + $0x40] sm:$0xff]  ;;  %v379_v18 = vld [vmem:[%s5720_s1 + $0x38] sm:$0xff] }
   0xe   : > { %477 = vmatpush.msra.mxu0 %v3591_v3  ;;  %v3620_v14 = vsub.f32 %v387_v0, %v3591_v3  ;;  %v3623_v15 = vsub.f32 %v386_v1, %v3593_v4  ;;  %707 = vmatpush.msra.mxu3 %v3591_v3  ;;  %v3627_v16 = vsub.f32 %v385_v2, %v3595_v5  ;;  %v3629_v17 = vand.u32 4294901760, %v381_v12  ;;  %v378_v26 = vld [vmem:[%s5720_s1 + $0x30] sm:$0xff]  ;;  %v377_v34 = vld [vmem:[%s5720_s1 + $0x28] sm:$0xff]  ;;  %v376_v42 = vld [vmem:[%s5720_s1 + $0x20] sm:$0xff]  ;;  %s5969_s10 = smov (!%p3695_p3, %s3474_s10), 1 }
   0xf   : > { %v3635_v19 = vsub.f32 %v384_v6, %v3606_v9  ;;  %v3638_v20 = vsub.f32 %v383_v7, %v3608_v10  ;;  %v3640_v21 = vand.u32 4294901760, %v380_v13  ;;  %v3648_v25 = vsub.f32 %v382_v8, %v3610_v11  ;;  %v375_v48 = vld [vmem:[%s5720_s1 + $0x18] sm:$0xff]  ;;  %v374_v54 = vld [vmem:[%s5720_s1 + $0x10] sm:$0xff]  ;;  %v373_v61 = vld [vmem:[%s5720_s1 + $0x8] sm:$0xff]  ;;  %s3485_s29 = smul.u32 144, %s5969_s10  ;;  %s3481_s15 = sshll.u32 %s5969_s10, 3 }
  0x10   : > { %479 = vmatpush.msra.mxu0 %v3593_v4  ;;  %644 = vmatpush.msra.mxu2 %v3620_v14  ;;  %v535_v22 = vand.u32 4294901760, %v3620_v14  ;;  %v5744_v23 = vand.u32 4294901760, %v3623_v15  ;;  %v5742_v24 = vand.u32 4294901760, %v3627_v16  ;;  %v3656_v28 = vsub.f32 %v381_v12, %v3629_v17  ;;  %v403_v59 = vld [vmem:[%s5720_s1 + $0xf8] sm:$0xff]  ;;  %v402_v2 = vld [vmem:[%s5720_s1 + $0xf0] sm:$0xff]  ;;  %v372_v7 = vld [vmem:[%s5720_s1] sm:$0xff]  ;;  %s349_s19 = scalar_lea.vmem %s5727_s8, %s3481_s15  ;;  %s353_s21 = scalar_lea.vmem %s5728_s9, %s3481_s15 }
  0x11   : > { %709 = vmatpush.msra.mxu3 %v3593_v4  ;;  %v5739_v27 = vand.u32 4294901760, %v3635_v19  ;;  %v3658_v29 = vand.u32 4294901760, %v379_v18  ;;  %v5738_v33 = vand.u32 4294901760, %v3638_v20  ;;  %v3677_v35 = vsub.f32 %v380_v13, %v3640_v21  ;;  %s3813_s17 = scalar_lea.vmem %s5719_s0, %s3485_s29  ;;  %s3486_s29 = smul.u32 24, %s5969_s10 }
  0x12   : > { %481 = vmatpush.msra.mxu0 %v3595_v5  ;;  %647 = vmatpush.msra.mxu2 %v3623_v15  ;;  %v536_v30 = vsub.f32 %v3620_v14, %v535_v22  ;;  %v542_v31 = vsub.f32 %v3623_v15, %v5744_v23  ;;  %v548_v32 = vsub.f32 %v3627_v16, %v5742_v24  ;;  %v3679_v36 = vand.u32 4294901760, %v378_v26 }
  0x13   : > { %711 = vmatpush.msra.mxu3 %v3595_v5  ;;  %v554_v39 = vsub.f32 %v3635_v19, %v5739_v27  ;;  %v5737_v40 = vand.u32 4294901760, %v3648_v25  ;;  %v3688_v41 = vand.u32 4294901760, %v377_v34  ;;  %v560_v44 = vsub.f32 %v3638_v20, %v5738_v33  ;;  %v396_v27 = vld [vmem:[%s5720_s1 + $0xc0] sm:$0xff]  ;;  %s5689_s13 = scalar_lea.vmem %s5726_s7, %s3486_s29 }
  0x14   : > { %483 = vmatpush.msra.mxu0 %v3606_v9  ;;  %650 = vmatpush.msra.mxu2 %v3627_v16  ;;  %v537_v37 = vand.u32 4294901760, %v536_v30  ;;  %v543_v38 = vand.u32 4294901760, %v542_v31  ;;  %v549_v43 = vand.u32 4294901760, %v548_v32  ;;  %v3704_v45 = vsub.f32 %v379_v18, %v3658_v29  ;;  %v401_v32 = vld [vmem:[%s5720_s1 + $0xe8] sm:$0xff] }
  0x15   : > { %713 = vmatpush.msra.mxu3 %v3606_v9  ;;  %v5735_v46 = vand.u32 4294901760, %v3656_v28  ;;  %v3710_v47 = vsub.f32 %v378_v26, %v3679_v36  ;;  %v555_v49 = vand.u32 4294901760, %v554_v39  ;;  %v566_v50 = vsub.f32 %v3648_v25, %v5737_v40 }
  0x16   : > { %485 = vmatpush.msra.mxu0 %v3608_v10  ;;  %538 = vmatpush.msra.mxu1 %v537_v37  ;;  %v3719_v51 = vand.u32 4294901760, %v376_v42  ;;  %v5734_v52 = vand.u32 4294901760, %v3677_v35  ;;  %v3725_v53 = vsub.f32 %v377_v34, %v3688_v41  ;;  %v561_v55 = vand.u32 4294901760, %v560_v44  ;;  %v400_v44 = vld [vmem:[%s5720_s1 + $0xe0] sm:$0xff] }
  0x17   : > { %653 = vmatpush.msra.mxu2 %v3635_v19  ;;  %715 = vmatpush.msra.mxu3 %v3608_v10  ;;  %v572_v56 = vsub.f32 %v3656_v28, %v5735_v46  ;;  %v3740_v57 = vand.u32 4294901760, %v375_v48  ;;  %v5733_v58 = vand.u32 4294901760, %v3704_v45  ;;  %v5731_v60 = vand.u32 4294901760, %v3710_v47  ;;  %v397_v46 = vld [vmem:[%s5720_s1 + $0xc8] sm:$0xff] }
  0x18   : > { %487 = vmatpush.msra.mxu0 %v3610_v11  ;;  %544 = vmatpush.msra.mxu1 %v543_v38  ;;  %v567_v62 = vand.u32 4294901760, %v566_v50  ;;  %v578_v63 = vsub.f32 %v3677_v35, %v5734_v52  ;;  %v3757_v0 = vsub.f32 %v376_v42, %v3719_v51  ;;  %v3759_v1 = vand.u32 4294901760, %v374_v54 }
  0x19   : > { %656 = vmatpush.msra.mxu2 %v3638_v20  ;;  %717 = vmatpush.msra.mxu3 %v3610_v11  ;;  %v5730_v6 = vand.u32 4294901760, %v3725_v53  ;;  %v3770_v8 = vand.u32 4294901760, %v403_v59  ;;  %v573_v12 = vand.u32 4294901760, %v572_v56  ;;  %v584_v13 = vsub.f32 %v3704_v45, %v5733_v58 }
  0x1a   : > { %489 = vmatpush.msra.mxu0 %v3629_v17  ;;  %550 = vmatpush.msra.mxu1 %v549_v43  ;;  %v3778_v18 = vsub.f32 %v375_v48, %v3740_v57  ;;  %v3780_v26 = vand.u32 4294901760, %v373_v61  ;;  %v590_v30 = vsub.f32 %v3710_v47, %v5731_v60  ;;  %v3787_v31 = vand.u32 4294901760, %v402_v2 }
  0x1b   : > { %659 = vmatpush.msra.mxu2 %v3648_v25  ;;  %719 = vmatpush.msra.mxu3 %v3629_v17  ;;  %v579_v34 = vand.u32 4294901760, %v578_v63  ;;  %v3794_v37 = vsub.f32 %v374_v54, %v3759_v1  ;;  %v3796_v38 = vand.u32 4294901760, %v372_v7  ;;  %v5729_v39 = vand.u32 4294901760, %v3757_v0 }
  0x1c   : > { %491 = vmatpush.msra.mxu0 %v3640_v21  ;;  %556 = vmatpush.msra.mxu1 %v555_v49  ;;  %5813 = vst [vmem:[#allocation2_spill] sm:$0xff] %v3780_v26  ;;  %v596_v42 = vsub.f32 %v3725_v53, %v5730_v6  ;;  %v3805_v43 = vsub.f32 %v403_v59, %v3770_v8  ;;  %v585_v48 = vand.u32 4294901760, %v584_v13  ;;  %v5732_v50 = vand.u32 4294901760, %v3778_v18  ;;  %v399_v59 = vld [vmem:[%s5720_s1 + $0xd8] sm:$0xff] }
  0x1d   : > { %662 = vmatpush.msra.mxu2 %v3656_v28  ;;  %721 = vmatpush.msra.mxu3 %v3640_v21  ;;  %5814 = vst [vmem:[#allocation3_spill] sm:$0xff] %v3796_v38  ;;  %v3817_v49 = vsub.f32 %v373_v61, %v3780_v26  ;;  %v3820_v54 = vand.u32 4294901760, %v401_v32  ;;  %v3825_v56 = vsub.f32 %v402_v2, %v3787_v31  ;;  %v5736_v63 = vand.u32 4294901760, %v3794_v37  ;;  %v354_v2 = vld [vmem:[%s3813_s17] sm:$0xff] }
  0x1e   : > { %493 = vmatpush.msra.mxu0 %v3658_v29  ;;  %562 = vmatpush.msra.mxu1 %v561_v55  ;;  %v591_v55 = vand.u32 4294901760, %v590_v30  ;;  %v602_v61 = vsub.f32 %v3757_v0, %v5729_v39  ;;  %v597_v13 = vand.u32 4294901760, %v596_v42  ;;  %v5740_v30 = vand.u32 4294901760, %v3805_v43  ;;  %v398_v42 = vld [vmem:[%s5720_s1 + $0xd0] sm:$0xff] }
  0x1f   : > { %665 = vmatpush.msra.mxu2 %v3677_v35  ;;  %723 = vmatpush.msra.mxu3 %v3658_v29  ;;  %v3850_v39 = vsub.f32 %v401_v32, %v3820_v54  ;;  %v3852_v6 = vand.u32 4294901760, %v399_v59  ;;  %v3860_v60 = vand.u32 4294901760, %v354_v2  ;;  %v614_v32 = vsub.f32 %v3794_v37, %v5736_v63 }
  0x20   : > { %495 = vmatpush.msra.mxu0 %v3679_v36  ;;  %568 = vmatpush.msra.mxu1 %v567_v62  ;;  %v3835_v62 = vsub.f32 %v372_v7, %v3796_v38  ;;  %v608_v7 = vsub.f32 %v3778_v18, %v5732_v50  ;;  %v603_v50 = vand.u32 4294901760, %v602_v61  ;;  %v3878_v61 = vand.u32 4294901760, %v398_v42 }
  0x21   : > { %668 = vmatpush.msra.mxu2 %v3704_v45  ;;  %725 = vmatpush.msra.mxu3 %v3679_v36  ;;  %v5747_v40 = vand.u32 4294901760, %v3850_v39  ;;  %v3886_v33 = vsub.f32 %v399_v59, %v3852_v6  ;;  %v615_v59 = vand.u32 4294901760, %v614_v32  ;;  %v3912_v23 = vand.u32 4294901760, %v396_v27  ;;  %v360_v32 = vld [vmem:[%s3813_s17 + $0x30] sm:$0xff] }
  0x22   : > { %497 = vmatpush.msra.mxu0 %v3688_v41  ;;  %574 = vmatpush.msra.mxu1 %v573_v12  ;;  %v3838_v12 = vand.u32 4294901760, %v400_v44  ;;  %v5745_v58 = vand.u32 4294901760, %v3835_v62  ;;  %v609_v63 = vand.u32 4294901760, %v608_v7  ;;  %v3897_v7 = vsub.f32 %v354_v2, %v3860_v60 }
  0x23   : > { %671 = vmatpush.msra.mxu2 %v3710_v47  ;;  %727 = vmatpush.msra.mxu3 %v3688_v41  ;;  %v3910_v2 = vsub.f32 %v398_v42, %v3878_v61  ;;  %5815 = vst [vmem:[#allocation4_spill] sm:$0xff] %v3912_v23  ;;  %v951_v14 = vsub.f32 %v3850_v39, %v5747_v40  ;;  %v5816_v42 = vand.u32 4294901760, %v3623_v15  ;;  %v394_v15 = vld [vmem:[%s5720_s1 + $0xb0] sm:$0xff]  ;;  %vm3156_vm7 = vcmask 64512  }
  0x24   : > { %499 = vmatpush.msra.mxu0 %v3719_v51  ;;  %580 = vmatpush.msra.mxu1 %v579_v34  ;;  %v5741_v34 = vand.u32 4294901760, %v3817_v49  ;;  %v3868_v52 = vsub.f32 %v400_v44, %v3838_v12  ;;  %vm3342_vm15 = vcmask 62464  }
  0x25   : > { %674 = vmatpush.msra.mxu2 %v3725_v53  ;;  %729 = vmatpush.msra.mxu3 %v3719_v51 }
  0x26   : > { %501 = vmatpush.msra.mxu0 %v3740_v57  ;;  %586 = vmatpush.msra.mxu1 %v585_v48  ;;  %v5743_v48 = vand.u32 4294901760, %v3825_v56  ;;  %v620_v44 = vsub.f32 %v3817_v49, %v5741_v34  ;;  %v626_v34 = vsub.f32 %v3835_v62, %v5745_v58 }
  0x27   : > { %677 = vmatpush.msra.mxu2 %v3757_v0  ;;  %731 = vmatpush.msra.mxu3 %v3740_v57 }
  0x28   : > { %503 = vmatpush.msra.mxu0 %v3759_v1  ;;  %592 = vmatpush.msra.mxu1 %v591_v55  ;;  %v939_v55 = vsub.f32 %v3805_v43, %v5740_v30  ;;  %v3899_v30 = vand.u32 4294901760, %v397_v46  ;;  %v621_v58 = vand.u32 4294901760, %v620_v44  ;;  %v5817_v44 = vand.u32 4294901760, %v3868_v52 }
  0x29   : > { %680 = vmatpush.msra.mxu2 %v3778_v18  ;;  %733 = vmatpush.msra.mxu3 %v3759_v1 }
  0x2a   : > { %505 = vmatpush.msra.mxu0 %v3780_v26  ;;  %598 = vmatpush.msra.mxu1 %v597_v13  ;;  %v945_v13 = vsub.f32 %v3825_v56, %v5743_v48  ;;  %v940_v48 = vand.u32 4294901760, %v939_v55  ;;  %v957_v40 = vsub.f32 %v3868_v52, %v5817_v44  ;;  %v5819_v44 = vand.u32 4294901760, %v3886_v33 }
  0x2b   : > { %683 = vmatpush.msra.mxu2 %v3794_v37  ;;  %735 = vmatpush.msra.mxu3 %v3780_v26  ;;  %v3928_v26 = vsub.f32 %v397_v46, %v3899_v30 }
  0x2c   : > { %507 = vmatpush.msra.mxu0 %v3796_v38  ;;  %604 = vmatpush.msra.mxu1 %v603_v50  ;;  %v395_v50 = vld [vmem:[%s5720_s1 + $0xb8] sm:$0xff]  ;;  %v946_v55 = vand.u32 4294901760, %v945_v13  ;;  %v3939_v13 = vand.u32 4294901760, %v360_v32  ;;  %v963_v24 = vsub.f32 %v3886_v33, %v5819_v44 }
  0x2d   : > { %686 = vmatpush.msra.mxu2 %v3817_v49  ;;  %737 = vmatpush.msra.mxu3 %v3796_v38  ;;  %v393_v38 = vld [vmem:[%s5720_s1 + $0xa8] sm:$0xff] }
  0x2e   : > { %760 = vmatpush.msrb.mxu0 %v535_v22  ;;  %610 = vmatpush.msra.mxu1 %v609_v63  ;;  %v627_v63 = vand.u32 4294901760, %v626_v34  ;;  %v3934_v22 = vand.u32 4294901760, %v395_v50  ;;  %v3945_v34 = vsub.f32 %v396_v27, %v3912_v23  ;;  %v3967_v46 = vsub.f32 %v360_v32, %v3939_v13 }
  0x2f   : > { %689 = vmatpush.msra.mxu2 %v3835_v62  ;;  %941 = vmatpush.msrb.mxu3 %v940_v48  ;;  %v5821_v48 = vand.u32 4294901760, %v3897_v7  ;;  %v964_v32 = vand.u32 4294901760, %v963_v24  ;;  %v366_v24 = vld [vmem:[%s3813_s17 + $0x60] sm:$0xff] }
  0x30   : > { %764 = vmatpush.msrb.mxu0 %v5816_v42  ;;  %616 = vmatpush.msra.mxu1 %v615_v59  ;;  %v5818_v42 = vand.u32 4294901760, %v3627_v16  ;;  %v952_v59 = vand.u32 4294901760, %v951_v14  ;;  %v5820_v16 = vand.u32 4294901760, %v3635_v19  ;;  %v958_v14 = vand.u32 4294901760, %v957_v40  ;;  %v392_v19 = vld [vmem:[%s5720_s1 + $0xa0] sm:$0xff] }
  0x31   : > { %880 = vmatpush.msrb.mxu2 %v3770_v8  ;;  %947 = vmatpush.msrb.mxu3 %v946_v55  ;;  %v511_v27 = vsub.f32 %v3897_v7, %v5821_v48  ;;  %v3964_v44 = vsub.f32 %v395_v50, %v3934_v22  ;;  %v5822_v55 = vand.u32 4294901760, %v3638_v20  ;;  %v5750_v50 = vand.u32 4294901760, %v3945_v34 }
  0x32   : > { %768 = vmatpush.msrb.mxu0 %v5818_v42  ;;  %622 = vmatpush.msra.mxu1 %v621_v58  ;;  %v5749_v42 = vand.u32 4294901760, %v3928_v26  ;;  %v3960_v58 = vand.u32 4294901760, %v394_v15  ;;  %v5824_v48 = vand.u32 4294901760, %v3648_v25  ;;  %v5752_v25 = vand.u32 4294901760, %v3967_v46 }
  0x33   : > { %882 = vmatpush.msrb.mxu2 %v3787_v31  ;;  %953 = vmatpush.msrb.mxu3 %v952_v59  ;;  %v512_v20 = vand.u32 4294901760, %v511_v27  ;;  %v391_v59 = vld [vmem:[%s5720_s1 + $0x98] sm:$0xff]  ;;  %v5825_v27 = vand.u32 4294901760, %v3656_v28  ;;  %v390_v28 = vld [vmem:[%s5720_s1 + $0x90] sm:$0xff] }
  0x34   : > { %772 = vmatpush.msrb.mxu0 %v5820_v16  ;;  %628 = vmatpush.msra.mxu1 %v627_v63  ;;  %v5823_v16 = vand.u32 4294901760, %v3910_v2  ;;  %v3979_v63 = vand.u32 4294901760, %v393_v38 }
  0x35   : > { %884 = vmatpush.msrb.mxu2 %v3820_v54  ;;  %959 = vmatpush.msrb.mxu3 %v958_v14  ;;  %v4010_v14 = vand.u32 4294901760, %v391_v59 }
  0x36   : > { %776 = vmatpush.msrb.mxu0 %v5822_v55  ;;  %835 = vmatpush.msrb.mxu1 %v3591_v3  ;;  %v969_v40 = vsub.f32 %v3910_v2, %v5823_v16  ;;  %v975_v3 = vsub.f32 %v3928_v26, %v5749_v42  ;;  %v3989_v55 = vsub.f32 %v394_v15, %v3960_v58  ;;  %v3991_v16 = vand.u32 4294901760, %v392_v19 }
  0x37   : > { %886 = vmatpush.msrb.mxu2 %v3838_v12  ;;  %v4007_v42 = vsub.f32 %v393_v38, %v3979_v63  ;;  %965 = vmatpush.msrb.mxu3 %v964_v32 }
  0x38   : > { %780 = vmatpush.msrb.mxu0 %v5824_v48  ;;  %837 = vmatpush.msrb.mxu1 %v3593_v4  ;;  %v5751_v4 = vand.u32 4294901760, %v3964_v44  ;;  %v970_v15 = vand.u32 4294901760, %v969_v40  ;;  %v981_v48 = vsub.f32 %v3945_v34, %v5750_v50  ;;  %v5753_v40 = vand.u32 4294901760, %v3989_v55 }
  0x39   : > { %888 = vmatpush.msrb.mxu2 %v3852_v6  ;;  %513 = vmatmul.f32.vlgmr.msra.gmra.mxu0 %v512_v20  ;;  %v4020_v38 = vsub.f32 %v392_v19, %v3991_v16  ;;  %v5826_v50 = vand.u32 4294901760, %v3677_v35  ;;  %v519_v20 = vsub.f32 %v3967_v46, %v5752_v25  ;;  %v998_v35 = vand.u32 4294901760, %v4007_v42 }
  0x3a   : > { %784 = vmatpush.msrb.mxu0 %v5825_v27  ;;  %839 = vmatpush.msrb.mxu1 %v3595_v5  ;;  %v4015_v27 = vand.u32 4294901760, %v366_v24  ;;  %v976_v5 = vand.u32 4294901760, %v975_v3  ;;  %v987_v32 = vsub.f32 %v3964_v44, %v5751_v4  ;;  %v982_v19 = vand.u32 4294901760, %v981_v48 }
  0x3b   : > { %890 = vmatpush.msrb.mxu2 %v3878_v61  ;;  %971 = vmatpush.msrb.mxu3 %v970_v15  ;;  %v5827_v3 = vand.u32 4294901760, %v3704_v45  ;;  %v4042_v4 = vsub.f32 %v391_v59, %v4010_v14  ;;  %v993_v45 = vsub.f32 %v3989_v55, %v5753_v40  ;;  %v5828_v59 = vand.u32 4294901760, %v3710_v47 }
  0x3c   : > { %841 = vmatpush.msrb.mxu1 %v3606_v9  ;;  %788 = vmatpush.msrb.mxu0 %v5826_v50  ;;  %v389_v9 = vld [vmem:[%s5720_s1 + $0x88] sm:$0xff]  ;;  %v4036_v50 = vand.u32 4294901760, %v390_v28  ;;  %v4045_v25 = vsub.f32 %v366_v24, %v4015_v27  ;;  %v988_v24 = vand.u32 4294901760, %v987_v32  ;;  %v5830_v47 = vand.u32 4294901760, %v3725_v53 }
  0x3d   : > { %892 = vmatpush.msrb.mxu2 %v3899_v30  ;;  %977 = vmatpush.msrb.mxu3 %v976_v5  ;;  %v4055_v48 = vand.u32 4294901760, %v389_v9  ;;  %v999_v5 = vsub.f32 %v4007_v42, %v998_v35 }
  0x3e   : > { %843 = vmatpush.msrb.mxu1 %v3608_v10  ;;  %792 = vmatpush.msrb.mxu0 %v5827_v3  ;;  %v388_v10 = vld [vmem:[%s5720_s1 + $0x80] sm:$0xff]  ;;  %v520_v3 = vand.u32 4294901760, %v519_v20  ;;  %v4065_v40 = vsub.f32 %v390_v28, %v4036_v50  ;;  %v526_v32 = vand.u32 4294901760, %v4045_v25  ;;  %v994_v20 = vand.u32 4294901760, %v993_v45 }
  0x3f   : > { %894 = vmatpush.msrb.mxu2 %v3912_v23  ;;  %983 = vmatpush.msrb.mxu3 %v982_v19  ;;  %v4067_v15 = vand.u32 4294901760, %v388_v10  ;;  %v5829_v23 = vand.u32 4294901760, %v3897_v7  ;;  %v5831_v28 = vand.u32 4294901760, %v4020_v38  ;;  %v1000_v53 = vand.u32 4294901760, %v999_v5 }
  0x40   : > { %692 = vmatmul.f32.vlgmr.msra.gmra.mxu2 %v3897_v7  ;;  %796 = vmatpush.msrb.mxu0 %v5828_v59  ;;  %v4081_v59 = vsub.f32 %v389_v9, %v4055_v48  ;;  %v527_v45 = vsub.f32 %v4045_v25, %v526_v32 }
  0x41   : > { %845 = vmatpush.msrb.mxu1 %v3610_v11  ;;  %896 = vmatpush.msrb.mxu2 %v3934_v22  ;;  %v1010_v11 = vand.u32 4294901760, %v4042_v4  ;;  %v1005_v19 = vsub.f32 %v4020_v38, %v5831_v28  ;;  %v4088_v7 = vsub.f32 %v388_v10, %v4067_v15 }
  0x42   : > { %741 = vmatmul.f32.vlgmr.msra.gmra.mxu3 %v5829_v23  ;;  %800 = vmatpush.msrb.mxu0 %v5830_v47  ;;  %v5832_v23 = vand.u32 4294901760, %v3757_v0  ;;  %v5833_v0 = vand.u32 4294901760, %v3778_v18  ;;  %v1022_v10 = vand.u32 4294901760, %v4081_v59  ;;  %v5834_v18 = vand.u32 4294901760, %v3794_v37 }
  0x43   : > { %847 = vmatpush.msrb.mxu1 %v3629_v17  ;;  %898 = vmatpush.msrb.mxu2 %v3960_v58  ;;  %v1016_v17 = vand.u32 4294901760, %v4065_v40  ;;  %v1011_v9 = vsub.f32 %v4042_v4, %v1010_v11  ;;  %v1028_v5 = vand.u32 4294901760, %v4088_v7 }
  0x44   : > { %989 = vmatpush.msrb.mxu3 %v988_v24  ;;  %521 = vmatmul.f32.gmra.mxu0 %v520_v3  ;;  %v1006_v24 = vand.u32 4294901760, %v1005_v19  ;;  %v5835_v19 = vand.u32 4294901760, %v3967_v46 }
  0x45   : > { %630 = vmatmul.f32.vlgmr.msra.gmra.mxu1 %v3860_v60  ;;  %804 = vmatpush.msrb.mxu0 %v5832_v23  ;;  %v1017_v3 = vsub.f32 %v4065_v40, %v1016_v17  ;;  %v1012_v47 = vand.u32 4294901760, %v1011_v9  ;;  %v5836_v23 = vand.u32 4294901760, %v3817_v49  ;;  %v1029_v37 = vsub.f32 %v4088_v7, %v1028_v5  ;;  %v361_v9 = vld [vmem:[%s3813_s17 + $0x38] sm:$0xff] }
  0x46   : > { %849 = vmatpush.msrb.mxu1 %v3640_v21  ;;  %900 = vmatpush.msrb.mxu2 %v3979_v63  ;;  %v355_v21 = vld [vmem:[%s3813_s17 + $0x8] sm:$0xff] }
  0x47   : > { %995 = vmatpush.msrb.mxu3 %v994_v20  ;;  %808 = vmatpush.msrb.mxu0 %v5833_v0  ;;  %v528_v20 = vand.u32 4294901760, %v527_v45  ;;  %v4116_v28 = vand.u32 4294901760, %v355_v21  ;;  %v5838_v45 = vand.u32 4294901760, %v3805_v43  ;;  %v5840_v0 = vld [vmem:[#allocation2_spill] sm:$0xff] }
  0x48   : > { %851 = vmatpush.msrb.mxu1 %v3658_v29  ;;  %902 = vmatpush.msrb.mxu2 %v3991_v16  ;;  %v1023_v29 = vsub.f32 %v4081_v59, %v1022_v10 }
  0x49   : > { %1001 = vmatpush.msrb.mxu3 %v1000_v53  ;;  %697 = vmatmul.f32.gmra.mxu2 %v3967_v46  ;;  %v5837_v46 = vand.u32 4294901760, %v3835_v62  ;;  %v4131_v49 = vsub.f32 %v355_v21, %v4116_v28 }
  0x4a   : > { %812 = vmatpush.msrb.mxu0 %v5834_v18  ;;  %853 = vmatpush.msrb.mxu1 %v3679_v36  ;;  %v1018_v36 = vand.u32 4294901760, %v1017_v3  ;;  %v1024_v53 = vand.u32 4294901760, %v1023_v29  ;;  %v5844_v3 = vand.u32 4294901760, %v3886_v33 }
  0x4b   : > { %904 = vmatpush.msrb.mxu2 %v4010_v14  ;;  %1007 = vmatpush.msrb.mxu3 %v1006_v24  ;;  %v913_v62 = vand.u32 4294901760, %v4131_v49  ;;  %v5842_v24 = vld [vmem:[#allocation3_spill] sm:$0xff] }
  0x4c   : > { %747 = vmatmul.f32.gmra.mxu3 %v5835_v19  ;;  %816 = vmatpush.msrb.mxu0 %v5836_v23 }
  0x4d   : > { %855 = vmatpush.msrb.mxu1 %v3688_v41  ;;  %906 = vmatpush.msrb.mxu2 %v4036_v50  ;;  %v1030_v41 = vand.u32 4294901760, %v1029_v37 }
  0x4e   : > { %1013 = vmatpush.msrb.mxu3 %v1012_v47  ;;  %529 = vmatmul.f32.gmra.mxu0 %v528_v20  ;;  %v412_v20 = vld [vmem:[%s5720_s1 + $0x140] sm:$0xff] }
  0x4f   : > { %634 = vmatmul.f32.gmra.mxu1 %v3939_v13  ;;  %820 = vmatpush.msrb.mxu0 %v5837_v46 }
  0x50   : > { %857 = vmatpush.msrb.mxu1 %v3719_v51  ;;  %908 = vmatpush.msrb.mxu2 %v4055_v48  ;;  %v4145_v51 = vand.u32 4294901760, %v361_v9 }
  0x51   : > { %1019 = vmatpush.msrb.mxu3 %v1018_v36  ;;  %1047 = vmatpush.msra.mxu0 %v3805_v43  ;;  %v914_v43 = vsub.f32 %v4131_v49, %v913_v62 }
  0x52   : > { %859 = vmatpush.msrb.mxu1 %v3740_v57  ;;  %910 = vmatpush.msrb.mxu2 %v4067_v15  ;;  %v5839_v57 = vand.u32 4294901760, %v3825_v56 }
  0x53   : > { %1025 = vmatpush.msrb.mxu3 %v1024_v53  ;;  %1050 = vmatpush.msra.mxu0 %v3825_v56  ;;  %v4162_v56 = vsub.f32 %v361_v9, %v4145_v51  ;;  %v4335_v53 = vand.u32 4294901760, %v412_v20 }
  0x54   : > { %1163 = vmatpush.msra.mxu2 %v5838_v45  ;;  %861 = vmatpush.msrb.mxu1 %v3759_v1  ;;  %v5841_v1 = vand.u32 4294901760, %v3850_v39  ;;  %v410_v45 = vld [vmem:[%s5720_s1 + $0x130] sm:$0xff] }
  0x55   : > { %702 = vmatmul.f32.gmra.mxu2 %v4045_v25  ;;  %1031 = vmatpush.msrb.mxu3 %v1030_v41  ;;  %v915_v25 = vand.u32 4294901760, %v914_v43  ;;  %v921_v21 = vand.u32 4294901760, %v4162_v56  ;;  %v4361_v43 = vsub.f32 %v412_v20, %v4335_v53  ;;  %v405_v20 = vld [vmem:[%s5720_s1 + $0x108] sm:$0xff] }
  0x56   : > { %1053 = vmatpush.msra.mxu0 %v3850_v39  ;;  %1167 = vmatpush.msra.mxu2 %v5839_v57  ;;  %v367_v39 = vld [vmem:[%s3813_s17 + $0x68] sm:$0xff] }
  0x57   : > { %1238 = vmatpush.msra.mxu3 %v3770_v8  ;;  %863 = vmatpush.msrb.mxu1 %v5840_v0  ;;  %v4179_v18 = vand.u32 4294901760, %v367_v39 }
  0x58   : > { %753 = vmatmul.f32.gmra.mxu3 %v526_v32  ;;  %1056 = vmatpush.msra.mxu0 %v3868_v52  ;;  %v5843_v32 = vand.u32 4294901760, %v3868_v52  ;;  %v5845_v52 = vand.u32 4294901760, %v3910_v2 }
  0x59   : > { %1171 = vmatpush.msra.mxu2 %v5841_v1  ;;  %1240 = vmatpush.msra.mxu3 %v3787_v31 }
  0x5a   : > { %638 = vmatmul.f32.gmra.mxu1 %v4015_v27  ;;  %822 = vmatmul.f32.vlgmr.msrb.gmra.mxu0 %v3860_v60 }
  0x5b   : > { %865 = vmatpush.msrb.mxu1 %v5842_v24  ;;  %1059 = vmatpush.msra.mxu0 %v3886_v33  ;;  %v5846_v33 = vand.u32 4294901760, %v3928_v26 }
  0x5c   : > { %1175 = vmatpush.msra.mxu2 %v5843_v32  ;;  %1242 = vmatpush.msra.mxu3 %v3820_v54  ;;  %v408_v32 = vld [vmem:[%s5720_s1 + $0x120] sm:$0xff] }
  0x5d   : > { %1110 = vmatpush.msra.mxu1 %v3770_v8  ;;  %1062 = vmatpush.msra.mxu0 %v3910_v2  ;;  %v922_v8 = vsub.f32 %v4162_v56, %v921_v21  ;;  %v5847_v2 = vand.u32 4294901760, %v3945_v34 }
  0x5e   : > { %1179 = vmatpush.msra.mxu2 %v5844_v3  ;;  %1244 = vmatpush.msra.mxu3 %v3838_v12 }
  0x5f   : > { %1112 = vmatpush.msra.mxu1 %v3787_v31  ;;  %916 = vmatmul.f32.vlgmr.msrb.gmra.mxu2 %v915_v25  ;;  %v4195_v31 = vsub.f32 %v367_v39, %v4179_v18 }
  0x60   : > { %1065 = vmatpush.msra.mxu0 %v3928_v26  ;;  %1183 = vmatpush.msra.mxu2 %v5845_v52 }
  0x61   : > { %1114 = vmatpush.msra.mxu1 %v3820_v54  ;;  %1246 = vmatpush.msra.mxu3 %v3852_v6  ;;  %v923_v54 = vand.u32 4294901760, %v922_v8  ;;  %v929_v26 = vand.u32 4294901760, %v4195_v31  ;;  %v356_v8 = vld [vmem:[%s3813_s17 + $0x10] sm:$0xff] }
  0x62   : > { %1033 = vmatmul.f32.vlgmr.msrb.gmra.mxu3 %v4116_v28  ;;  %1068 = vmatpush.msra.mxu0 %v3945_v34 }
  0x63   : > { %1116 = vmatpush.msra.mxu1 %v3838_v12  ;;  %1187 = vmatpush.msra.mxu2 %v5846_v33  ;;  %v5848_v12 = vand.u32 4294901760, %v3964_v44  ;;  %v930_v34 = vsub.f32 %v4195_v31, %v929_v26 }
  0x64   : > { %1248 = vmatpush.msra.mxu3 %v3878_v61  ;;  %826 = vmatmul.f32.gmra.mxu0 %v3939_v13 }
  0x65   : > { %867 = vmatmul.f32.vlgmr.msrb.gmra.mxu1 %v3860_v60  ;;  %1071 = vmatpush.msra.mxu0 %v3964_v44  ;;  %v5849_v60 = vld [vmem:[#allocation4_spill] sm:$0xff] }
  0x66   : > { %1118 = vmatpush.msra.mxu1 %v3852_v6  ;;  %1191 = vmatpush.msra.mxu2 %v5847_v2  ;;  %v5850_v6 = vand.u32 4294901760, %v3989_v55  ;;  %v418_v44 = vld [vmem:[%s5720_s1 + $0x170] sm:$0xff]  ;;  %v407_v2 = vld [vmem:[%s5720_s1 + $0x118] sm:$0xff] }
  0x67   : > { %1250 = vmatpush.msra.mxu3 %v3899_v30  ;;  %1074 = vmatpush.msra.mxu0 %v3989_v55 }
  0x68   : > { %1120 = vmatpush.msra.mxu1 %v3878_v61  ;;  %1195 = vmatpush.msra.mxu2 %v5848_v12  ;;  %v931_v61 = vand.u32 4294901760, %v930_v34 }
  0x69   : > { %1252 = vmatpush.msra.mxu3 %v5849_v60  ;;  %924 = vmatmul.f32.gmra.mxu2 %v923_v54  ;;  %v5761_v54 = vand.u32 4294901760, %v4361_v43 }
  0x6a   : > { %1077 = vmatpush.msra.mxu0 %v4007_v42  ;;  %1122 = vmatpush.msra.mxu1 %v3899_v30  ;;  %v419_v30 = vld [vmem:[%s5720_s1 + $0x178] sm:$0xff]  ;;  %v5851_v42 = vand.u32 4294901760, %v4020_v38 }
  0x6b   : > { %1199 = vmatpush.msra.mxu2 %v5850_v6  ;;  %1254 = vmatpush.msra.mxu3 %v3934_v22  ;;  %v4237_v55 = vand.u32 4294901760, %v419_v30 }
  0x6c   : > { %1037 = vmatmul.f32.gmra.mxu3 %v4145_v51  ;;  %1080 = vmatpush.msra.mxu0 %v4020_v38 }
  0x6d   : > { %1124 = vmatpush.msra.mxu1 %v5849_v60  ;;  %1203 = vmatpush.msra.mxu2 %v998_v35  ;;  %v4247_v35 = vand.u32 4294901760, %v418_v44  ;;  %v4400_v60 = vand.u32 4294901760, %v408_v32 }
  0x6e   : > { %1256 = vmatpush.msra.mxu3 %v3960_v58  ;;  %830 = vmatmul.f32.gmra.mxu0 %v4015_v27 }
  0x6f   : > { %871 = vmatmul.f32.gmra.mxu1 %v3939_v13  ;;  %1083 = vmatpush.msra.mxu0 %v4042_v4  ;;  %v417_v13 = vld [vmem:[%s5720_s1 + $0x168] sm:$0xff] }
  0x70   : > { %1126 = vmatpush.msra.mxu1 %v3934_v22  ;;  %1207 = vmatpush.msra.mxu2 %v5851_v42  ;;  %v4253_v22 = vsub.f32 %v419_v30, %v4237_v55  ;;  %v4255_v38 = vand.u32 4294901760, %v417_v13  ;;  %v4407_v30 = vand.u32 4294901760, %v356_v8 }
  0x71   : > { %1258 = vmatpush.msra.mxu3 %v3979_v63  ;;  %1086 = vmatpush.msra.mxu0 %v4065_v40  ;;  %v415_v40 = vld [vmem:[%s5720_s1 + $0x158] sm:$0xff] }
  0x72   : > { %1128 = vmatpush.msra.mxu1 %v3960_v58  ;;  %1211 = vmatpush.msra.mxu2 %v1010_v11  ;;  %v416_v58 = vld [vmem:[%s5720_s1 + $0x160] sm:$0xff]  ;;  %v4279_v11 = vsub.f32 %v417_v13, %v4255_v38 }
  0x73   : > { %1260 = vmatpush.msra.mxu3 %v3991_v16  ;;  %932 = vmatmul.f32.gmra.mxu2 %v931_v61  ;;  %v4271_v4 = vand.u32 4294901760, %v416_v58 }
  0x74   : > { %1089 = vmatpush.msra.mxu0 %v4081_v59  ;;  %1130 = vmatpush.msra.mxu1 %v3979_v63  ;;  %v4266_v63 = vsub.f32 %v418_v44, %v4247_v35  ;;  %v4290_v59 = vand.u32 4294901760, %v415_v40  ;;  %v5768_v47 = vand.u32 4294901760, %v4279_v11  ;;  %v4413_v44 = vand.u32 4294901760, %v407_v2 }
  0x75   : > { %1215 = vmatpush.msra.mxu2 %v1016_v17  ;;  %1262 = vmatpush.msra.mxu3 %v4010_v14  ;;  %v1341_v17 = vand.u32 4294901760, %v4253_v22 }
  0x76   : > { %1041 = vmatmul.f32.gmra.mxu3 %v4179_v18  ;;  %1092 = vmatpush.msra.mxu0 %v4088_v7  ;;  %v4320_v29 = vsub.f32 %v415_v40, %v4290_v59  ;;  %v1354_v37 = vsub.f32 %v4279_v11, %v5768_v47  ;;  %v4428_v40 = vsub.f32 %v408_v32, %v4400_v60  ;;  %v362_v32 = vld [vmem:[%s3813_s17 + $0x40] sm:$0xff] }
  0x77   : > { %1132 = vmatpush.msra.mxu1 %v3991_v16  ;;  %1219 = vmatpush.msra.mxu2 %v1022_v10  ;;  %v414_v16 = vld [vmem:[%s5720_s1 + $0x150] sm:$0xff]  ;;  %v4296_v10 = vsub.f32 %v416_v58, %v4271_v4  ;;  %v1342_v7 = vsub.f32 %v4253_v22, %v1341_v17  ;;  %v1384_v58 = vsub.f32 %v4361_v43, %v5761_v54 }
  0x78   : > { %1264 = vmatpush.msra.mxu3 %v4036_v50  ;;  %875 = vmatmul.f32.gmra.mxu1 %v4015_v27  ;;  %v5769_v27 = vand.u32 4294901760, %v4266_v63  ;;  %v5764_v9 = vand.u32 4294901760, %v4320_v29  ;;  %v1355_v0 = vand.u32 4294901760, %v1354_v37 }
  0x79   : > { %1095 = vmatmul.f32.vlgmr.msra.gmra.mxu0 %v4131_v49  ;;  %1134 = vmatpush.msra.mxu1 %v4010_v14  ;;  %v413_v14 = vld [vmem:[%s5720_s1 + $0x148] sm:$0xff]  ;;  %v5766_v23 = vand.u32 4294901760, %v4296_v10  ;;  %v1343_v36 = vand.u32 4294901760, %v1342_v7 }
  0x7a   : > { %1283 = vmatpush.msrb.mxu0 %v4237_v55  ;;  %1223 = vmatpush.msra.mxu2 %v1028_v5  ;;  %v4306_v5 = vand.u32 4294901760, %v414_v16  ;;  %v4322_v19 = vand.u32 4294901760, %v413_v14  ;;  %v409_v49 = vld [vmem:[%s5720_s1 + $0x128] sm:$0xff]  ;;  %v1366_v24 = vsub.f32 %v4320_v29, %v5764_v9  ;;  %v430_v9 = vld [vmem:[%s5720_s1 + $0x1d0] sm:$0xff] }
  0x7b   : > { %1266 = vmatpush.msra.mxu3 %v4055_v48  ;;  %1136 = vmatpush.msra.mxu1 %v4036_v50  ;;  %v1348_v50 = vsub.f32 %v4266_v63, %v5769_v27  ;;  %v4384_v52 = vand.u32 4294901760, %v409_v49  ;;  %v4569_v47 = vand.u32 4294901760, %v430_v9 }
  0x7c   : > { %1450 = vmatpush.msrb.mxu2 %v4253_v22  ;;  %1285 = vmatpush.msrb.mxu0 %v4247_v35  ;;  %v4333_v46 = vsub.f32 %v414_v16, %v4306_v5  ;;  %v4345_v41 = vsub.f32 %v413_v14, %v4322_v19  ;;  %v1367_v6 = vand.u32 4294901760, %v1366_v24 }
  0x7d   : > { %1268 = vmatpush.msra.mxu3 %v4067_v15  ;;  %1225 = vmatmul.f32.vlgmr.msra.gmra.mxu2 %v4116_v28  ;;  %v4411_v61 = vsub.f32 %v409_v49, %v4384_v52  ;;  %v5757_v49 = vand.u32 4294901760, %v4428_v40 }
  0x7e   : > { %1287 = vmatpush.msrb.mxu0 %v4255_v38  ;;  %1453 = vmatpush.msrb.mxu2 %v4266_v63  ;;  %v5763_v1 = vand.u32 4294901760, %v4333_v46  ;;  %v5762_v25 = vand.u32 4294901760, %v4345_v41 }
  0x7f   : > { %1513 = vmatpush.msrb.mxu3 %v4237_v55  ;;  %1138 = vmatpush.msra.mxu1 %v4055_v48  ;;  %v411_v48 = vld [vmem:[%s5720_s1 + $0x138] sm:$0xff]  ;;  %v5756_v37 = vand.u32 4294901760, %v4411_v61 }
  0x80   : > { %1270 = vmatmul.f32.vlgmr.msra.gmra.mxu3 %v4116_v28  ;;  %1289 = vmatpush.msrb.mxu0 %v4271_v4  ;;  %v1349_v28 = vand.u32 4294901760, %v1348_v50  ;;  %v4357_v57 = vand.u32 4294901760, %v411_v48  ;;  %v1372_v33 = vsub.f32 %v4333_v46, %v5763_v1  ;;  %v1378_v34 = vsub.f32 %v4345_v41, %v5762_v25 }
  0x81   : > { %1456 = vmatpush.msrb.mxu2 %v4279_v11  ;;  %1515 = vmatpush.msrb.mxu3 %v4247_v35 }
  0x82   : > { %1140 = vmatpush.msra.mxu1 %v4067_v15  ;;  %1100 = vmatmul.f32.gmra.mxu0 %v4162_v56  ;;  %v1360_v15 = vsub.f32 %v4296_v10, %v5766_v23  ;;  %v4382_v3 = vsub.f32 %v411_v48, %v4357_v57  ;;  %v1373_v13 = vand.u32 4294901760, %v1372_v33  ;;  %v1379_v14 = vand.u32 4294901760, %v1378_v34 }
  0x83   : > { %1144 = vmatmul.f32.vlgmr.msra.gmra.mxu1 %v913_v62  ;;  %1291 = vmatpush.msrb.mxu0 %v4290_v59  ;;  %v4369_v62 = vand.u32 4294901760, %v410_v45  ;;  %v4438_v56 = vsub.f32 %v356_v8, %v4407_v30  ;;  %v1385_v48 = vand.u32 4294901760, %v1384_v58  ;;  %v4490_v58 = vand.u32 4294901760, %v362_v32 }
  0x84   : > { %1344 = vmatpush.msrb.mxu1 %v1343_v36  ;;  %1459 = vmatpush.msrb.mxu2 %v4296_v10  ;;  %v1361_v39 = vand.u32 4294901760, %v1360_v15  ;;  %v5759_v42 = vand.u32 4294901760, %v4382_v3  ;;  %v4449_v36 = vsub.f32 %v407_v2, %v4413_v44  ;;  %v4461_v15 = vand.u32 4294901760, %v405_v20 }
  0x85   : > { %1517 = vmatpush.msrb.mxu3 %v4255_v38  ;;  %1293 = vmatpush.msrb.mxu0 %v4306_v5  ;;  %v4398_v12 = vsub.f32 %v410_v45, %v4369_v62  ;;  %v5767_v8 = vand.u32 4294901760, %v4438_v56  ;;  %v1402_v2 = vsub.f32 %v4411_v61, %v5756_v37 }
  0x86   : > { %1350 = vmatpush.msrb.mxu1 %v1349_v28  ;;  %1462 = vmatpush.msrb.mxu2 %v4320_v29  ;;  %v1390_v50 = vsub.f32 %v4382_v3, %v5759_v42  ;;  %v434_v28 = vld [vmem:[%s5720_s1 + $0x1f0] sm:$0xff]  ;;  %5852 = vst [vmem:[#allocation2_spill] sm:$0xff] %v4461_v15  ;;  %v4527_v42 = vsub.f32 %v362_v32, %v4490_v58 }
  0x87   : > { %1519 = vmatpush.msrb.mxu3 %v4271_v4  ;;  %1229 = vmatmul.f32.gmra.mxu2 %v4145_v51  ;;  %v5758_v16 = vand.u32 4294901760, %v4398_v12  ;;  %v4481_v34 = vand.u32 4294901760, %v434_v28 }
  0x88   : > { %1295 = vmatpush.msrb.mxu0 %v4322_v19  ;;  %1356 = vmatpush.msrb.mxu1 %v1355_v0  ;;  %v404_v0 = vld [vmem:[%s5720_s1 + $0x100] sm:$0xff]  ;;  %v1391_v33 = vand.u32 4294901760, %v1390_v50  ;;  %v1408_v50 = vsub.f32 %v4428_v40, %v5757_v49 }
  0x89   : > { %1465 = vmatpush.msrb.mxu2 %v4333_v46  ;;  %1521 = vmatpush.msrb.mxu3 %v4290_v59  ;;  %v1396_v45 = vsub.f32 %v4398_v12, %v5758_v16  ;;  %v432_v49 = vld [vmem:[%s5720_s1 + $0x1e0] sm:$0xff] }
  0x8a   : > { %1274 = vmatmul.f32.gmra.mxu3 %v4145_v51  ;;  %1297 = vmatpush.msrb.mxu0 %v4335_v53  ;;  %v406_v51 = vld [vmem:[%s5720_s1 + $0x110] sm:$0xff]  ;;  %v4535_v54 = vand.u32 4294901760, %v432_v49 }
  0x8b   : > { %1362 = vmatpush.msrb.mxu1 %v1361_v39  ;;  %1468 = vmatpush.msrb.mxu2 %v4345_v41  ;;  %v4432_v7 = vand.u32 4294901760, %v406_v51 }
  0x8c   : > { %1523 = vmatpush.msrb.mxu3 %v4306_v5  ;;  %1105 = vmatmul.f32.gmra.mxu0 %v4195_v31  ;;  %v4565_v23 = vsub.f32 %v432_v49, %v4535_v54 }
  0x8d   : > { %1150 = vmatmul.f32.gmra.mxu1 %v921_v21  ;;  %1299 = vmatpush.msrb.mxu0 %v4357_v57  ;;  %v435_v21 = vld [vmem:[%s5720_s1 + $0x1f8] sm:$0xff]  ;;  %v4472_v39 = vsub.f32 %v406_v51, %v4432_v7  ;;  %v4485_v51 = vand.u32 4294901760, %v404_v0 }
  0x8e   : > { %1368 = vmatpush.msrb.mxu1 %v1367_v6  ;;  %1471 = vmatpush.msrb.mxu2 %v4361_v43  ;;  %v4467_v24 = vand.u32 4294901760, %v435_v21  ;;  %v5760_v6 = vand.u32 4294901760, %v4449_v36 }
  0x8f   : > { %1525 = vmatpush.msrb.mxu3 %v4322_v19  ;;  %1301 = vmatpush.msrb.mxu0 %v4369_v62  ;;  %5854 = vst [vmem:[#allocation4_spill] sm:$0xff] %v4485_v51  ;;  %v4524_v16 = vsub.f32 %v404_v0, %v4485_v51 }
  0x90   : > { %1374 = vmatpush.msrb.mxu1 %v1373_v13  ;;  %1474 = vmatpush.msrb.mxu2 %v4382_v3  ;;  %5853 = vst [vmem:[#allocation3_spill] sm:$0xff] %v4467_v24  ;;  %v433_v13 = vld [vmem:[%s5720_s1 + $0x1e8] sm:$0xff]  ;;  %v4500_v37 = vsub.f32 %v435_v21, %v4467_v24  ;;  %v1414_v21 = vsub.f32 %v4449_v36, %v5760_v6 }
  0x91   : > { %1527 = vmatpush.msrb.mxu3 %v4335_v53  ;;  %1233 = vmatmul.f32.gmra.mxu2 %v4179_v18  ;;  %v4516_v31 = vand.u32 4294901760, %v433_v13 }
  0x92   : > { %1303 = vmatpush.msrb.mxu0 %v4384_v52  ;;  %1380 = vmatpush.msrb.mxu1 %v1379_v14  ;;  %v1397_v14 = vand.u32 4294901760, %v1396_v45  ;;  %v5765_v45 = vand.u32 4294901760, %v4472_v39 }
  0x93   : > { %1477 = vmatpush.msrb.mxu2 %v4398_v12  ;;  %1529 = vmatpush.msrb.mxu3 %v4357_v57  ;;  %v4545_v25 = vsub.f32 %v433_v13, %v4516_v31 }
  0x94   : > { %1278 = vmatmul.f32.gmra.mxu3 %v4179_v18  ;;  %1305 = vmatpush.msrb.mxu0 %v4400_v60  ;;  %v4497_v18 = vsub.f32 %v405_v20, %v4461_v15  ;;  %v1403_v20 = vand.u32 4294901760, %v1402_v2  ;;  %v5770_v2 = vand.u32 4294901760, %v4500_v37  ;;  %v1420_v32 = vsub.f32 %v4472_v39, %v5765_v45 }
  0x95   : > { %1386 = vmatpush.msrb.mxu1 %v1385_v48  ;;  %1480 = vmatpush.msrb.mxu2 %v4411_v61  ;;  %v1317_v48 = vsub.f32 %v4438_v56, %v5767_v8  ;;  %v5773_v45 = vand.u32 4294901760, %v4524_v16 }
  0x96   : > { %1531 = vmatpush.msrb.mxu3 %v4369_v62  ;;  %1156 = vmatmul.f32.gmra.mxu1 %v929_v26  ;;  %v4519_v26 = vsub.f32 %v434_v28, %v4481_v34  ;;  %v1409_v28 = vand.u32 4294901760, %v1408_v50  ;;  %v5771_v6 = vand.u32 4294901760, %v4497_v18  ;;  %v1745_v13 = vsub.f32 %v4500_v37, %v5770_v2 }
  0x97   : > { %1307 = vmatpush.msrb.mxu0 %v4413_v44  ;;  %1392 = vmatpush.msrb.mxu1 %v1391_v33  ;;  %v431_v33 = vld [vmem:[%s5720_s1 + $0x1d8] sm:$0xff]  ;;  %v1318_v0 = vand.u32 4294901760, %v1317_v48  ;;  %v368_v48 = vld [vmem:[%s3813_s17 + $0x70] sm:$0xff]  ;;  %v1421_v8 = vand.u32 4294901760, %v1420_v32  ;;  %v1432_v32 = vsub.f32 %v4524_v16, %v5773_v45  ;;  %v5855_v45 = vand.u32 4294901760, %v4266_v63 }
  0x98   : > { %1483 = vmatpush.msrb.mxu2 %v4428_v40  ;;  %1533 = vmatpush.msrb.mxu3 %v4384_v52  ;;  %v5772_v50 = vand.u32 4294901760, %v4519_v26  ;;  %v4547_v1 = vand.u32 4294901760, %v431_v33  ;;  %v4574_v27 = vand.u32 4294901760, %v368_v48  ;;  %v1746_v22 = vand.u32 4294901760, %v1745_v13 }
  0x99   : > { %1309 = vmatpush.msrb.mxu0 %v4432_v7  ;;  %1398 = vmatpush.msrb.mxu1 %v1397_v14  ;;  %v1415_v14 = vand.u32 4294901760, %v1414_v21  ;;  %v1426_v21 = vsub.f32 %v4497_v18, %v5771_v6 }
  0x9a   : > { %1486 = vmatpush.msrb.mxu2 %v4449_v36  ;;  %1535 = vmatpush.msrb.mxu3 %v4400_v60  ;;  %v1751_v49 = vsub.f32 %v4519_v26, %v5772_v50  ;;  %v4581_v6 = vsub.f32 %v431_v33, %v4547_v1  ;;  %v4606_v2 = vsub.f32 %v368_v48, %v4574_v27  ;;  %v1433_v48 = vand.u32 4294901760, %v1432_v32 }
  0x9b   : > { %1311 = vmatpush.msrb.mxu0 %v4461_v15  ;;  %1404 = vmatpush.msrb.mxu1 %v1403_v20  ;;  %v5774_v20 = vand.u32 4294901760, %v4527_v42  ;;  %v5860_v32 = vand.u32 4294901760, %v4296_v10  ;;  %v425_v10 = vld [vmem:[%s5720_s1 + $0x1a8] sm:$0xff] }
  0x9c   : > { %1489 = vmatpush.msrb.mxu2 %v4472_v39  ;;  %1537 = vmatpush.msrb.mxu3 %v4413_v44  ;;  %v1752_v13 = vand.u32 4294901760, %v1751_v49 }
  0x9d   : > { %1313 = vmatpush.msrb.mxu0 %v4485_v51  ;;  %1410 = vmatpush.msrb.mxu1 %v1409_v28  ;;  %v429_v28 = vld [vmem:[%s5720_s1 + $0x1c8] sm:$0xff] }
  0x9e   : > { %1492 = vmatpush.msrb.mxu2 %v4497_v18  ;;  %1539 = vmatpush.msrb.mxu3 %v4432_v7  ;;  %v4598_v50 = vand.u32 4294901760, %v429_v28 }
  0x9f   : > { %1319 = vmatmul.f32.vlgmr.msrb.gmra.mxu0 %v1318_v0  ;;  %1416 = vmatpush.msrb.mxu1 %v1415_v14  ;;  %v1325_v0 = vsub.f32 %v4527_v42, %v5774_v20  ;;  %v428_v14 = vld [vmem:[%s5720_s1 + $0x1c0] sm:$0xff]  ;;  %v4603_v20 = vsub.f32 %v430_v9, %v4569_v47 }
  0xa0   : > { %1566 = vmatpush.msra.mxu0 %v1341_v17  ;;  %1495 = vmatpush.msrb.mxu2 %v4524_v16  ;;  %v1427_v17 = vand.u32 4294901760, %v1426_v21  ;;  %v5856_v21 = vand.u32 4294901760, %v4545_v25  ;;  %v4617_v9 = vand.u32 4294901760, %v428_v14 }
  0xa1   : > { %1541 = vmatpush.msrb.mxu3 %v4461_v15  ;;  %1422 = vmatpush.msrb.mxu1 %v1421_v8  ;;  %v427_v15 = vld [vmem:[%s5720_s1 + $0x1b8] sm:$0xff]  ;;  %v5780_v8 = vand.u32 4294901760, %v4581_v6  ;;  %v1326_v33 = vand.u32 4294901760, %v1325_v0  ;;  %v5779_v0 = vand.u32 4294901760, %v4603_v20 }
  0xa2   : > { %1686 = vmatpush.msra.mxu2 %v4467_v24  ;;  %1570 = vmatpush.msra.mxu0 %v5855_v45  ;;  %v1757_v63 = vsub.f32 %v4545_v25, %v5856_v21  ;;  %v5857_v45 = vand.u32 4294901760, %v4279_v11  ;;  %v4626_v24 = vsub.f32 %v429_v28, %v4598_v50  ;;  %v4628_v21 = vand.u32 4294901760, %v427_v15  ;;  %v426_v11 = vld [vmem:[%s5720_s1 + $0x1b0] sm:$0xff] }
  0xa3   : > { %1543 = vmatpush.msrb.mxu3 %v4485_v51  ;;  %1498 = vmatmul.f32.vlgmr.msrb.gmra.mxu2 %v4438_v56  ;;  %v5858_v51 = vand.u32 4294901760, %v4565_v23  ;;  %v1769_v28 = vsub.f32 %v4581_v6, %v5780_v8 }
  0xa4   : > { %1574 = vmatpush.msra.mxu0 %v5857_v45  ;;  %1688 = vmatpush.msra.mxu2 %v4481_v34  ;;  %v5859_v45 = vand.u32 4294901760, %v4438_v56  ;;  %v4649_v56 = vand.u32 4294901760, %v426_v11 }
  0xa5   : > { %1747 = vmatpush.msra.mxu3 %v1746_v22  ;;  %1428 = vmatpush.msrb.mxu1 %v1427_v17  ;;  %v1763_v49 = vsub.f32 %v4565_v23, %v5858_v51  ;;  %v5781_v22 = vand.u32 4294901760, %v4606_v2  ;;  %v1758_v51 = vand.u32 4294901760, %v1757_v63  ;;  %v4644_v17 = vsub.f32 %v428_v14, %v4617_v9  ;;  %v424_v14 = vld [vmem:[%s5720_s1 + $0x1a0] sm:$0xff] }
  0xa6   : > { %1547 = vmatmul.f32.vlgmr.msrb.gmra.mxu3 %v5859_v45  ;;  %1578 = vmatpush.msra.mxu0 %v5860_v32  ;;  %v5782_v45 = vand.u32 4294901760, %v4626_v24  ;;  %v4656_v32 = vsub.f32 %v427_v15, %v4628_v21  ;;  %v5862_v15 = vand.u32 4294901760, %v4333_v46  ;;  %v4682_v8 = vand.u32 4294901760, %v424_v14 }
  0xa7   : > { %1690 = vmatpush.msra.mxu2 %v4516_v31  ;;  %1753 = vmatpush.msra.mxu3 %v1752_v13  ;;  %v5861_v13 = vand.u32 4294901760, %v4320_v29  ;;  %v1764_v63 = vand.u32 4294901760, %v1763_v49  ;;  %v1333_v29 = vsub.f32 %v4606_v2, %v5781_v22  ;;  %v1770_v49 = vand.u32 4294901760, %v1769_v28 }
  0xa8   : > { %1434 = vmatpush.msrb.mxu1 %v1433_v48  ;;  %1327 = vmatmul.f32.gmra.mxu0 %v1326_v33  ;;  %v1775_v33 = vsub.f32 %v4603_v20, %v5779_v0  ;;  %v4669_v48 = vand.u32 4294901760, %v425_v10  ;;  %v4680_v0 = vsub.f32 %v426_v11, %v4649_v56  ;;  %v1781_v46 = vsub.f32 %v4626_v24, %v5782_v45 }
  0xa9   : > { %1436 = vmatmul.f32.vlgmr.msrb.gmra.mxu1 %v4407_v30  ;;  %1582 = vmatpush.msra.mxu0 %v5861_v13  ;;  %v5783_v13 = vand.u32 4294901760, %v4644_v17  ;;  %v5863_v28 = vand.u32 4294901760, %v4345_v41 }
  0xaa   : > { %1641 = vmatpush.msra.mxu1 %v4237_v55  ;;  %1692 = vmatpush.msra.mxu2 %v4535_v54  ;;  %v423_v55 = vld [vmem:[%s5720_s1 + $0x198] sm:$0xff]  ;;  %v1776_v11 = vand.u32 4294901760, %v1775_v33  ;;  %v1798_v41 = vand.u32 4294901760, %v4680_v0 }
  0xab   : > { %1759 = vmatpush.msra.mxu3 %v1758_v51  ;;  %1586 = vmatpush.msra.mxu0 %v5862_v15  ;;  %v1334_v15 = vand.u32 4294901760, %v1333_v29  ;;  %v4698_v22 = vand.u32 4294901760, %v423_v55  ;;  %v1787_v45 = vsub.f32 %v4644_v17, %v5783_v13  ;;  %v5864_v51 = vand.u32 4294901760, %v4527_v42  ;;  %v421_v29 = vld [vmem:[%s5720_s1 + $0x188] sm:$0xff] }
  0xac   : > { %1643 = vmatpush.msra.mxu1 %v4247_v35  ;;  %1694 = vmatpush.msra.mxu2 %v4547_v1  ;;  %v422_v35 = vld [vmem:[%s5720_s1 + $0x190] sm:$0xff]  ;;  %v4733_v13 = vand.u32 4294901760, %v421_v29 }
  0xad   : > { %1765 = vmatpush.msra.mxu3 %v1764_v63  ;;  %1503 = vmatmul.f32.gmra.mxu2 %v4527_v42  ;;  %v4696_v63 = vsub.f32 %v425_v10, %v4669_v48  ;;  %v4710_v10 = vsub.f32 %v424_v14, %v4682_v8  ;;  %v4712_v33 = vand.u32 4294901760, %v422_v35  ;;  %v1782_v42 = vand.u32 4294901760, %v1781_v46 }
  0xae   : > { %1590 = vmatpush.msra.mxu0 %v5863_v28  ;;  %1645 = vmatpush.msra.mxu1 %v4255_v38  ;;  %v5865_v38 = vand.u32 4294901760, %v4361_v43  ;;  %v420_v28 = vld [vmem:[%s5720_s1 + $0x180] sm:$0xff]  ;;  %v1788_v46 = vand.u32 4294901760, %v1787_v45 }
  0xaf   : > { %1696 = vmatpush.msra.mxu2 %v4569_v47  ;;  %1771 = vmatpush.msra.mxu3 %v1770_v49  ;;  %v5866_v49 = vand.u32 4294901760, %v4656_v32  ;;  %v1804_v14 = vand.u32 4294901760, %v4696_v63 }
  0xb0   : > { %1553 = vmatmul.f32.gmra.mxu3 %v5864_v51  ;;  %1594 = vmatpush.msra.mxu0 %v5865_v38  ;;  %v4724_v51 = vsub.f32 %v423_v55, %v4698_v22  ;;  %v357_v38 = vld [vmem:[%s3813_s17 + $0x18] sm:$0xff]  ;;  %v1799_v55 = vsub.f32 %v4680_v0, %v1798_v41 }
  0xb1   : > { %1647 = vmatpush.msra.mxu1 %v4271_v4  ;;  %1698 = vmatpush.msra.mxu2 %v4598_v50  ;;  %v1793_v43 = vsub.f32 %v4656_v32, %v5866_v49  ;;  %v5867_v4 = vand.u32 4294901760, %v4382_v3  ;;  %v5868_v3 = vand.u32 4294901760, %v4398_v12  ;;  %v4746_v49 = vand.u32 4294901760, %v420_v28 }
  0xb2   : > { %1777 = vmatpush.msra.mxu3 %v1776_v11  ;;  %1335 = vmatmul.f32.gmra.mxu0 %v1334_v15  ;;  %v1810_v11 = vand.u32 4294901760, %v4710_v10  ;;  %v4742_v15 = vsub.f32 %v422_v35, %v4712_v33  ;;  %v1816_v35 = vand.u32 4294901760, %v4724_v51  ;;  %v4758_v12 = vsub.f32 %v421_v29, %v4733_v13 }
  0xb3   : > { %1440 = vmatmul.f32.gmra.mxu1 %v4490_v58  ;;  %1598 = vmatpush.msra.mxu0 %v5867_v4  ;;  %v1794_v45 = vand.u32 4294901760, %v1793_v43  ;;  %v4748_v4 = vand.u32 4294901760, %v357_v38 }
  0xb4   : > { %1649 = vmatpush.msra.mxu1 %v4290_v59  ;;  %1700 = vmatpush.msra.mxu2 %v4617_v9  ;;  %v1805_v59 = vsub.f32 %v4696_v63, %v1804_v14  ;;  %v1811_v43 = vsub.f32 %v4710_v10, %v1810_v11 }
  0xb5   : > { %1783 = vmatpush.msra.mxu3 %v1782_v42  ;;  %1602 = vmatpush.msra.mxu0 %v5868_v3  ;;  %v5869_v42 = vand.u32 4294901760, %v4411_v61  ;;  %v1822_v3 = vand.u32 4294901760, %v4742_v15  ;;  %v4772_v29 = vsub.f32 %v357_v38, %v4748_v4  ;;  %v5870_v61 = vand.u32 4294901760, %v4606_v2 }
  0xb6   : > { %1651 = vmatpush.msra.mxu1 %v4306_v5  ;;  %1702 = vmatpush.msra.mxu2 %v4628_v21  ;;  %v1800_v5 = vand.u32 4294901760, %v1799_v55  ;;  %v1806_v55 = vand.u32 4294901760, %v1805_v59  ;;  %v1812_v38 = vand.u32 4294901760, %v1811_v43  ;;  %v5873_v43 = vand.u32 4294901760, %v4472_v39 }
  0xb7   : > { %1789 = vmatpush.msra.mxu3 %v1788_v46  ;;  %1508 = vmatmul.f32.gmra.mxu2 %v4606_v2  ;;  %v4769_v46 = vsub.f32 %v420_v28, %v4746_v49  ;;  %v1828_v28 = vand.u32 4294901760, %v4758_v12  ;;  %v363_v2 = vld [vmem:[%s3813_s17 + $0x48] sm:$0xff]  ;;  %v1719_v59 = vand.u32 4294901760, %v4772_v29 }
  0xb8   : > { %1606 = vmatpush.msra.mxu0 %v5869_v42  ;;  %1653 = vmatpush.msra.mxu1 %v4322_v19  ;;  %v5871_v19 = vand.u32 4294901760, %v4428_v40  ;;  %v1817_v42 = vsub.f32 %v4724_v51, %v1816_v35  ;;  %v1823_v40 = vsub.f32 %v4742_v15, %v1822_v3 }
  0xb9   : > { %1704 = vmatpush.msra.mxu2 %v4649_v56  ;;  %1795 = vmatpush.msra.mxu3 %v1794_v45  ;;  %v5872_v45 = vand.u32 4294901760, %v4449_v36  ;;  %v1829_v36 = vsub.f32 %v4758_v12, %v1828_v28 }
  0xba   : > { %1559 = vmatmul.f32.gmra.mxu3 %v5870_v61  ;;  %1610 = vmatpush.msra.mxu0 %v5871_v19  ;;  %v4801_v61 = vand.u32 4294901760, %v363_v2  ;;  %v5874_v19 = vand.u32 4294901760, %v4497_v18 }
  0xbb   : > { %1655 = vmatpush.msra.mxu1 %v4335_v53  ;;  %1706 = vmatpush.msra.mxu2 %v4669_v48  ;;  %v1834_v53 = vand.u32 4294901760, %v4769_v46  ;;  %v1830_v18 = vand.u32 4294901760, %v1829_v36  ;;  %v5881_v36 = vld [vmem:[#allocation4_spill] sm:$0xff] }
  0xbc   : > { %1801 = vmatpush.msra.mxu3 %v1800_v5  ;;  %1444 = vmatmul.f32.gmra.mxu1 %v4574_v27  ;;  %v1818_v5 = vand.u32 4294901760, %v1817_v42 }
  0xbd   : > { %1614 = vmatpush.msra.mxu0 %v5872_v45  ;;  %1657 = vmatpush.msra.mxu1 %v4357_v57  ;;  %v1824_v57 = vand.u32 4294901760, %v1823_v40  ;;  %v1835_v39 = vsub.f32 %v4769_v46, %v1834_v53  ;;  %v5877_v45 = vand.u32 4294901760, %v4519_v26 }
  0xbe   : > { %1708 = vmatpush.msra.mxu2 %v4682_v8  ;;  %1807 = vmatpush.msra.mxu3 %v1806_v55  ;;  %v5875_v55 = vand.u32 4294901760, %v4524_v16  ;;  %v369_v16 = vld [vmem:[%s3813_s17 + $0x78] sm:$0xff] }
  0xbf   : > { %1618 = vmatpush.msra.mxu0 %v5873_v43  ;;  %1659 = vmatpush.msra.mxu1 %v4369_v62  ;;  %v1720_v62 = vsub.f32 %v4772_v29, %v1719_v59  ;;  %v1836_v42 = vand.u32 4294901760, %v1835_v39 }
  0xc0   : > { %1710 = vmatpush.msra.mxu2 %v4698_v22  ;;  %1813 = vmatpush.msra.mxu3 %v1812_v38 }
  0xc1   : > { %1622 = vmatpush.msra.mxu0 %v5874_v19  ;;  %1661 = vmatpush.msra.mxu1 %v4384_v52  ;;  %v4818_v52 = vsub.f32 %v363_v2, %v4801_v61  ;;  %v1721_v38 = vand.u32 4294901760, %v1720_v62  ;;  %v4833_v2 = vand.u32 4294901760, %v369_v16 }
  0xc2   : > { %1712 = vmatpush.msra.mxu2 %v4712_v33  ;;  %1819 = vmatpush.msra.mxu3 %v1818_v5  ;;  %v5878_v5 = vld [vmem:[#allocation3_spill] sm:$0xff] }
  0xc3   : > { %1626 = vmatpush.msra.mxu0 %v5875_v55  ;;  %1663 = vmatpush.msra.mxu1 %v4400_v60  ;;  %v5876_v60 = vand.u32 4294901760, %v4500_v37  ;;  %v1727_v40 = vand.u32 4294901760, %v4818_v52  ;;  %v4855_v19 = vpop.f32.mrf.mxu2 }
  0xc4   : > { %1714 = vmatpush.msra.mxu2 %v4733_v13  ;;  %1825 = vmatpush.msra.mxu3 %v1824_v57  ;;  %v4853_v57 = vpop.f32.mrf.mxu1 }
  0xc5   : > { %1628 = vmatmul.f32.vlgmr.msra.gmra.mxu0 %v4407_v30  ;;  %1665 = vmatpush.msra.mxu1 %v4413_v44  ;;  %v4831_v44 = vpop.f32.mrf.mxu0  ;;  %v1728_v43 = vsub.f32 %v4818_v52, %v1727_v40  ;;  %v4865_v55 = vpop.f32.mrf.mxu3 }
  0xc6   : > { %1853 = vmatpush.msrb.mxu0 %v4500_v37  ;;  %1716 = vmatpush.msra.mxu2 %v4746_v49  ;;  %v5879_v37 = vld [vmem:[#allocation2_spill] sm:$0xff] }
  0xc7   : > { %1831 = vmatpush.msra.mxu3 %v1830_v18  ;;  %1667 = vmatpush.msra.mxu1 %v4432_v7  ;;  %v5880_v7 = vand.u32 4294901760, %v4545_v25  ;;  %v1729_v39 = vand.u32 4294901760, %v1728_v43 }
  0xc8   : > { %1969 = vmatpush.msrb.mxu2 %v5876_v60  ;;  %1856 = vmatpush.msrb.mxu0 %v4519_v26  ;;  %v4849_v26 = vsub.f32 %v369_v16, %v4833_v2 }
  0xc9   : > { %1837 = vmatpush.msra.mxu3 %v1836_v42  ;;  %1722 = vmatmul.f32.vlgmr.msra.gmra.mxu2 %v1721_v38  ;;  %v5887_v38 = vand.u32 4294901760, %v4656_v32 }
  0xca   : > { %1859 = vmatpush.msrb.mxu0 %v4545_v25  ;;  %1973 = vmatpush.msrb.mxu2 %v5877_v45  ;;  %v5882_v25 = vand.u32 4294901760, %v4565_v23  ;;  %v5790_v62 = vand.u32 4294901760, %v4849_v26 }
  0xcb   : > { %2044 = vmatpush.msrb.mxu3 %v5878_v5  ;;  %1669 = vmatpush.msra.mxu1 %v5879_v37  ;;  %v444_v37 = vld [vmem:[%s5720_s1 + $0x240] sm:$0xff] }
  0xcc   : > { %1839 = vmatmul.f32.vlgmr.msra.gmra.mxu3 %v4748_v4  ;;  %1862 = vmatpush.msrb.mxu0 %v4565_v23  ;;  %v5884_v23 = vand.u32 4294901760, %v4603_v20 }
  0xcd   : > { %1977 = vmatpush.msrb.mxu2 %v5880_v7  ;;  %2046 = vmatpush.msrb.mxu3 %v4481_v34  ;;  %v4871_v18 = vpop.f32.mrf.mxu0 }
  0xce   : > { %1671 = vmatpush.msra.mxu1 %v5881_v36  ;;  %1632 = vmatmul.f32.gmra.mxu0 %v4490_v58 }
  0xcf   : > { %1673 = vmatmul.f32.vlgmr.msra.gmra.mxu1 %v4407_v30  ;;  %1865 = vmatpush.msrb.mxu0 %v4581_v6  ;;  %v5883_v30 = vand.u32 4294901760, %v4581_v6  ;;  %v5885_v6 = vand.u32 4294901760, %v4626_v24 }
  0xd0   : > { %1916 = vmatpush.msrb.mxu1 %v5878_v5  ;;  %1981 = vmatpush.msrb.mxu2 %v5882_v25 }
  0xd1   : > { %2048 = vmatpush.msrb.mxu3 %v4516_v31  ;;  %1868 = vmatpush.msrb.mxu0 %v4603_v20  ;;  %v4890_v20 = vpop.f32.mrf.mxu2 }
  0xd2   : > { %1918 = vmatpush.msrb.mxu1 %v4481_v34  ;;  %1985 = vmatpush.msrb.mxu2 %v5883_v30  ;;  %v1736_v34 = vsub.f32 %v4849_v26, %v5790_v62  ;;  %v5046_v30 = vand.u32 4294901760, %v444_v37 }
  0xd3   : > { %2050 = vmatpush.msrb.mxu3 %v4535_v54  ;;  %1730 = vmatmul.f32.gmra.mxu2 %v1729_v39 }
  0xd4   : > { %1871 = vmatpush.msrb.mxu0 %v4626_v24  ;;  %1920 = vmatpush.msrb.mxu1 %v4516_v31  ;;  %v4888_v31 = vpop.f32.mrf.mxu1  ;;  %v1737_v42 = vand.u32 4294901760, %v1736_v34  ;;  %v4899_v24 = vpop.f32.mrf.mxu3  ;;  %5892 = vst [vmem:[#allocation6_spill] sm:$0xff] %v5046_v30 }
  0xd5   : > { %1989 = vmatpush.msrb.mxu2 %v5884_v23  ;;  %2052 = vmatpush.msrb.mxu3 %v4547_v1 }
  0xd6   : > { %1843 = vmatmul.f32.gmra.mxu3 %v4801_v61  ;;  %1874 = vmatpush.msrb.mxu0 %v4644_v17 }
  0xd7   : > { %1922 = vmatpush.msrb.mxu1 %v4535_v54  ;;  %1993 = vmatpush.msrb.mxu2 %v5885_v6  ;;  %v5886_v54 = vand.u32 4294901760, %v4644_v17  ;;  %v442_v6 = vld [vmem:[%s5720_s1 + $0x230] sm:$0xff] }
  0xd8   : > { %2054 = vmatpush.msrb.mxu3 %v4569_v47  ;;  %1636 = vmatmul.f32.gmra.mxu0 %v4574_v27 }
  0xd9   : > { %1677 = vmatmul.f32.gmra.mxu1 %v4490_v58  ;;  %1877 = vmatpush.msrb.mxu0 %v4656_v32  ;;  %v4905_v58 = vpop.f32.mrf.mxu0  ;;  %v4929_v17 = vpop.f32.mrf.mxu2 }
  0xda   : > { %1924 = vmatpush.msrb.mxu1 %v4547_v1  ;;  %1997 = vmatpush.msrb.mxu2 %v5886_v54  ;;  %v450_v1 = vld [vmem:[%s5720_s1 + $0x270] sm:$0xff]  ;;  %v441_v54 = vld [vmem:[%s5720_s1 + $0x228] sm:$0xff] }
  0xdb   : > { %2056 = vmatpush.msrb.mxu3 %v4598_v50  ;;  %1880 = vmatpush.msrb.mxu0 %v4680_v0 }
  0xdc   : > { %1926 = vmatpush.msrb.mxu1 %v4569_v47  ;;  %2001 = vmatpush.msrb.mxu2 %v5887_v38  ;;  %v451_v47 = vld [vmem:[%s5720_s1 + $0x278] sm:$0xff]  ;;  %v4927_v0 = vpop.f32.mrf.mxu1  ;;  %v4943_v32 = vpop.f32.mrf.mxu3  ;;  %v5071_v38 = vld [vmem:[%s5721_s2] ss:$0 sm:$0xff] }
  0xdd   : > { %2058 = vmatpush.msrb.mxu3 %v4617_v9  ;;  %1738 = vmatmul.f32.gmra.mxu2 %v1737_v42 }
  0xde   : > { %1883 = vmatpush.msrb.mxu0 %v4696_v63  ;;  %1928 = vmatpush.msrb.mxu1 %v4598_v50  ;;  %v4925_v50 = vand.u32 4294901760, %v451_v47 }
  0xdf   : > { %2005 = vmatpush.msrb.mxu2 %v1798_v41  ;;  %2060 = vmatpush.msrb.mxu3 %v4628_v21  ;;  %v448_v41 = vld [vmem:[%s5720_s1 + $0x260] sm:$0xff] }
  0xe0   : > { %1847 = vmatmul.f32.gmra.mxu3 %v4833_v2  ;;  %1886 = vmatpush.msrb.mxu0 %v4710_v10 }
  0xe1   : > { %1930 = vmatpush.msrb.mxu1 %v4617_v9  ;;  %2009 = vmatpush.msrb.mxu2 %v1804_v14  ;;  %v449_v9 = vld [vmem:[%s5720_s1 + $0x268] sm:$0xff]  ;;  %v4968_v14 = vand.u32 4294901760, %v448_v41 }
  0xe2   : > { %2062 = vmatpush.msrb.mxu3 %v4649_v56  ;;  %1681 = vmatmul.f32.gmra.mxu1 %v4574_v27  ;;  %v4939_v27 = vand.u32 4294901760, %v450_v1  ;;  %v4951_v63 = vand.u32 4294901760, %v449_v9 }
  0xe3   : > { %1889 = vmatpush.msrb.mxu0 %v4724_v51  ;;  %1932 = vmatpush.msrb.mxu1 %v4628_v21  ;;  %v4949_v21 = vsub.f32 %v451_v47, %v4925_v50  ;;  %5888 = vst [vmem:[#allocation3_spill] sm:$0xff] %v4968_v14 }
  0xe4   : > { %2013 = vmatpush.msrb.mxu2 %v1810_v11  ;;  %2064 = vmatpush.msrb.mxu3 %v4669_v48  ;;  %v4964_v10 = vsub.f32 %v450_v1, %v4939_v27  ;;  %v4977_v51 = vsub.f32 %v449_v9, %v4951_v63  ;;  %v5082_v9 = vsub.f32 %v444_v37, %v5046_v30 }
  0xe5   : > { %1892 = vmatpush.msrb.mxu0 %v4742_v15  ;;  %1934 = vmatpush.msrb.mxu1 %v4649_v56  ;;  %v4958_v56 = vpop.f32.mrf.mxu0  ;;  %v5789_v11 = vand.u32 4294901760, %v4949_v21  ;;  %v5013_v60 = vpop.f32.mrf.mxu3 }
  0xe6   : > { %2017 = vmatpush.msrb.mxu2 %v1816_v35  ;;  %2066 = vmatpush.msrb.mxu3 %v4682_v8  ;;  %v5788_v35 = vand.u32 4294901760, %v4964_v10  ;;  %v5787_v16 = vand.u32 4294901760, %v4977_v51 }
  0xe7   : > { %1895 = vmatpush.msrb.mxu0 %v4758_v12  ;;  %1936 = vmatpush.msrb.mxu1 %v4669_v48  ;;  %v447_v48 = vld [vmem:[%s5720_s1 + $0x258] sm:$0xff]  ;;  %v4991_v12 = vpop.f32.mrf.mxu1 }
  0xe8   : > { %2021 = vmatpush.msrb.mxu2 %v1822_v3  ;;  %2068 = vmatpush.msrb.mxu3 %v4698_v22  ;;  %v4988_v15 = vand.u32 4294901760, %v447_v48  ;;  %v4993_v3 = vpop.f32.mrf.mxu2  ;;  %v2160_v39 = vsub.f32 %v4977_v51, %v5787_v16 }
  0xe9   : > { %1898 = vmatpush.msrb.mxu0 %v4769_v46  ;;  %1938 = vmatpush.msrb.mxu1 %v4682_v8  ;;  %v446_v8 = vld [vmem:[%s5720_s1 + $0x250] sm:$0xff]  ;;  %v445_v46 = vld [vmem:[%s5720_s1 + $0x248] sm:$0xff] }
  0xea   : > { %2025 = vmatpush.msrb.mxu2 %v1828_v28  ;;  %2070 = vmatpush.msrb.mxu3 %v4712_v33  ;;  %5889 = vst [vmem:[#allocation2_spill] sm:$0xff] %v4988_v15  ;;  %v2148_v28 = vsub.f32 %v4949_v21, %v5789_v11  ;;  %v5021_v45 = vsub.f32 %v447_v48, %v4988_v15  ;;  %v5023_v5 = vand.u32 4294901760, %v445_v46 }
  0xeb   : > { %1901 = vmatmul.f32.vlgmr.msrb.gmra.mxu0 %v4772_v29  ;;  %1940 = vmatpush.msrb.mxu1 %v4698_v22  ;;  %v4998_v22 = vsub.f32 %v448_v41, %v4968_v14  ;;  %v2161_v29 = vand.u32 4294901760, %v2160_v39  ;;  %v5084_v41 = vand.u32 4294901760, %v442_v6  ;;  %v358_v39 = vld [vmem:[%s3813_s17 + $0x20] sm:$0xff] }
  0xec   : > { %2089 = vmatpush.msra.mxu0 %v4925_v50  ;;  %2029 = vmatpush.msrb.mxu2 %v1834_v53  ;;  %v5008_v53 = vand.u32 4294901760, %v446_v8  ;;  %5891 = vst [vmem:[#allocation5_spill] sm:$0xff] %v5023_v5  ;;  %v2149_v36 = vand.u32 4294901760, %v2148_v28  ;;  %v5051_v23 = vsub.f32 %v445_v46, %v5023_v5  ;;  %v5784_v34 = vand.u32 4294901760, %v5021_v45  ;;  %v440_v28 = vld [vmem:[%s5720_s1 + $0x220] sm:$0xff] }
  0xed   : > { %2072 = vmatpush.msrb.mxu3 %v4733_v13  ;;  %1942 = vmatpush.msrb.mxu1 %v4712_v33  ;;  %v2154_v33 = vsub.f32 %v4964_v10, %v5788_v35  ;;  %v5785_v43 = vand.u32 4294901760, %v4998_v22  ;;  %v5031_v7 = vpop.f32.mrf.mxu0  ;;  %5894 = vst [vmem:[#allocation8_spill] sm:$0xff] %v5084_v41 }
  0xee   : > { %2256 = vmatpush.msra.mxu2 %v4949_v21  ;;  %2091 = vmatpush.msra.mxu0 %v4939_v27  ;;  %5890 = vst [vmem:[#allocation4_spill] sm:$0xff] %v5008_v53  ;;  %v5039_v25 = vsub.f32 %v446_v8, %v5008_v53  ;;  %v2172_v48 = vsub.f32 %v5021_v45, %v5784_v34  ;;  %v5090_v8 = vand.u32 4294901760, %v441_v54  ;;  %v5791_v46 = vand.u32 4294901760, %v5051_v23 }
  0xef   : > { %2074 = vmatpush.msrb.mxu3 %v4746_v49  ;;  %2031 = vmatmul.f32.vlgmr.msrb.gmra.mxu2 %v4748_v4  ;;  %v5075_v47 = vpop.f32.mrf.mxu1 }
  0xf0   : > { %2093 = vmatpush.msra.mxu0 %v4951_v63  ;;  %2259 = vmatpush.msra.mxu2 %v4964_v10  ;;  %v5077_v1 = vpop.f32.mrf.mxu2  ;;  %5895 = vst [vmem:[#allocation9_spill] sm:$0xff] %v5090_v8  ;;  %v2184_v16 = vsub.f32 %v5051_v23, %v5791_v46  ;;  %v5129_v35 = vsub.f32 %v441_v54, %v5090_v8 }
  0xf1   : > { %2319 = vmatpush.msra.mxu3 %v4925_v50  ;;  %1944 = vmatpush.msrb.mxu1 %v4733_v13  ;;  %v443_v13 = vld [vmem:[%s5720_s1 + $0x238] sm:$0xff] }
  0xf2   : > { %2076 = vmatmul.f32.vlgmr.msrb.gmra.mxu3 %v4748_v4  ;;  %2095 = vmatpush.msra.mxu0 %v4968_v14  ;;  %v2155_v4 = vand.u32 4294901760, %v2154_v33  ;;  %v5063_v42 = vand.u32 4294901760, %v443_v13 }
  0xf3   : > { %2262 = vmatpush.msra.mxu2 %v4977_v51  ;;  %2321 = vmatpush.msra.mxu3 %v4939_v27 }
  0xf4   : > { %1946 = vmatpush.msrb.mxu1 %v4746_v49  ;;  %1906 = vmatmul.f32.gmra.mxu0 %v4818_v52  ;;  %v2166_v49 = vsub.f32 %v4998_v22, %v5785_v43  ;;  %5893 = vst [vmem:[#allocation7_spill] sm:$0xff] %v5063_v42  ;;  %v5099_v37 = vsub.f32 %v443_v13, %v5063_v42  ;;  %v5118_v43 = vand.u32 4294901760, %v440_v28  ;;  %v437_v52 = vld [vmem:[%s5720_s1 + $0x208] sm:$0xff] }
  0xf5   : > { %1950 = vmatmul.f32.vlgmr.msrb.gmra.mxu1 %v1719_v59  ;;  %2097 = vmatpush.msra.mxu0 %v4988_v15  ;;  %v5786_v59 = vand.u32 4294901760, %v5039_v25  ;;  %v5116_v13 = vsub.f32 %v442_v6, %v5084_v41  ;;  %v5131_v6 = vand.u32 4294901760, %v358_v39 }
  0xf6   : > { %2150 = vmatpush.msra.mxu1 %v2149_v36  ;;  %2265 = vmatpush.msra.mxu2 %v4998_v22  ;;  %v2167_v33 = vand.u32 4294901760, %v2166_v49  ;;  %5896 = vst [vmem:[#allocation10_spill] sm:$0xff] %v5099_v37  ;;  %v5101_v36 = vpop.f32.mrf.mxu3  ;;  %v439_v49 = vld [vmem:[%s5720_s1 + $0x218] sm:$0xff]  ;;  %v5150_v46 = vsub.f32 %v440_v28, %v5118_v43 }
  0xf7   : > { %2323 = vmatpush.msra.mxu3 %v4951_v63  ;;  %2099 = vmatpush.msra.mxu0 %v5008_v53  ;;  %v2178_v34 = vsub.f32 %v5039_v25, %v5786_v59  ;;  %5897 = vst [vmem:[#allocation11_spill] sm:$0xff] %v5116_v13  ;;  %v2173_v59 = vand.u32 4294901760, %v2172_v48  ;;  %v5134_v11 = vand.u32 4294901760, %v439_v49  ;;  %v5163_v28 = vpop.f32.mrf.mxu1 }
  0xf8   : > { %2156 = vmatpush.msra.mxu1 %v2155_v4  ;;  %2268 = vmatpush.msra.mxu2 %v5021_v45  ;;  %v515_v4 = vadd.f32 %v5071_v38, %v4831_v44  ;;  %5898 = vst [vmem:[#allocation12_spill] sm:$0xff] %v5118_v43  ;;  %v5792_v44 = vand.u32 4294901760, %v5082_v9 }
  0xf9   : > { %2325 = vmatpush.msra.mxu3 %v4968_v14  ;;  %2035 = vmatmul.f32.gmra.mxu2 %v4801_v61  ;;  %5899 = vst [vmem:[#allocation13_spill] sm:$0xff] %v5134_v11  ;;  %v2179_v54 = vand.u32 4294901760, %v2178_v34  ;;  %v5161_v34 = vsub.f32 %v358_v39, %v5131_v6  ;;  %v5173_v62 = vsub.f32 %v439_v49, %v5134_v11  ;;  %v461_v39 = vld [vmem:[%s5720_s1 + $0x2c8] sm:$0xff] }
  0xfa   : > { %2101 = vmatpush.msra.mxu0 %v5023_v5  ;;  %2162 = vmatpush.msra.mxu1 %v2161_v29  ;;  %v5121_v29 = vpop.f32.mrf.mxu0  ;;  %v632_v48 = vadd.f32 %v4853_v57, %v515_v4  ;;  %v2185_v57 = vand.u32 4294901760, %v2184_v16  ;;  %5901 = vst [vmem:[#allocation15_spill] sm:$0xff] %v5163_v28  ;;  %v5903_v16 = vand.u32 4294901760, %v5099_v37  ;;  %v5204_v14 = vand.u32 4294901760, %v461_v39 }
  0xfb   : > { %2271 = vmatpush.msra.mxu2 %v5039_v25  ;;  %2327 = vmatpush.msra.mxu3 %v4988_v15 }
  0xfc   : > { %2080 = vmatmul.f32.gmra.mxu3 %v4801_v61  ;;  %2103 = vmatpush.msra.mxu0 %v5046_v30  ;;  %v438_v61 = vld [vmem:[%s5720_s1 + $0x210] sm:$0xff] }
  0xfd   : > { %2168 = vmatpush.msra.mxu1 %v2167_v33  ;;  %2274 = vmatpush.msra.mxu2 %v5051_v23  ;;  %v2190_v33 = vsub.f32 %v5082_v9, %v5792_v44  ;;  %v5154_v4 = vand.u32 4294901760, %v438_v61  ;;  %v5165_v44 = vpop.f32.mrf.mxu2 }
  0xfe   : > { %2329 = vmatpush.msra.mxu3 %v5008_v53  ;;  %1911 = vmatmul.f32.gmra.mxu0 %v4849_v26  ;;  %5902 = vst [vmem:[#allocation16_spill] sm:$0xff] %v5165_v44  ;;  %v694_v53 = vadd.f32 %v4855_v19, %v632_v48  ;;  %v5904_v44 = vand.u32 4294901760, %v5116_v13  ;;  %v5194_v48 = vpop.f32.mrf.mxu3 }
  0xff   : > { %1956 = vmatmul.f32.gmra.mxu1 %v1727_v40  ;;  %2105 = vmatpush.msra.mxu0 %v5063_v42  ;;  %5900 = vst [vmem:[#allocation14_spill] sm:$0xff] %v5154_v4  ;;  %v523_v40 = vadd.f32 %v5071_v38, %v4871_v18  ;;  %v2191_v49 = vand.u32 4294901760, %v2190_v33  ;;  %v5191_v18 = vand.u32 4294901760, %v437_v52 }
 0x100   : > { %2174 = vmatpush.msra.mxu1 %v2173_v59  ;;  %2277 = vmatpush.msra.mxu2 %v5082_v9  ;;  %v2196_v59 = vsub.f32 %v5099_v37, %v5903_v16  ;;  %v364_v16 = vld [vmem:[%s3813_s17 + $0x50] sm:$0xff]  ;;  %v2202_v15 = vsub.f32 %v5116_v13, %v5904_v44  ;;  %5906 = vst [vmem:[#allocation18_spill] sm:$0xff] %v5194_v48 }
 0x101   : > { %2331 = vmatpush.msra.mxu3 %v5023_v5  ;;  %2107 = vmatpush.msra.mxu0 %v5084_v41  ;;  %v436_v5 = vld [vmem:[%s5720_s1 + $0x200] sm:$0xff]  ;;  %5905 = vst [vmem:[#allocation17_spill] sm:$0xff] %v5191_v18  ;;  %v5213_v28 = vand.u32 4294901760, %v364_v16 }
 0x102   : > { %2180 = vmatpush.msra.mxu1 %v2179_v54  ;;  %2280 = vmatpush.msra.mxu2 %v5099_v37  ;;  %v5907_v54 = vand.u32 4294901760, %v5129_v35  ;;  %v5201_v37 = vsub.f32 %v438_v61, %v5154_v4  ;;  %v2197_v44 = vand.u32 4294901760, %v2196_v59  ;;  %v5208_v19 = vand.u32 4294901760, %v436_v5  ;;  %v5210_v48 = vpop.f32.mrf.mxu0 }
 0x103   : > { %2333 = vmatpush.msra.mxu3 %v5046_v30  ;;  %2039 = vmatmul.f32.gmra.mxu2 %v4833_v2  ;;  %v743_v61 = vadd.f32 %v4865_v55, %v694_v53  ;;  %v636_v59 = vadd.f32 %v4888_v31, %v523_v40  ;;  %v2203_v33 = vand.u32 4294901760, %v2202_v15  ;;  %v5227_v55 = vsub.f32 %v437_v52, %v5191_v18 }
 0x104   : > { %2109 = vmatpush.msra.mxu0 %v5090_v8  ;;  %2186 = vmatpush.msra.mxu1 %v2185_v57  ;;  %v2208_v30 = vsub.f32 %v5129_v35, %v5907_v54  ;;  %5908 = vst [vmem:[#allocation19_spill] sm:$0xff] %v5201_v37  ;;  %v460_v54 = vld [vmem:[%s5720_s1 + $0x2c0] sm:$0xff]  ;;  %v5910_v57 = vand.u32 4294901760, %v5150_v46  ;;  %v5237_v15 = vsub.f32 %v461_v39, %v5204_v14  ;;  %v5913_v52 = vand.u32 4294901760, %v5173_v62  ;;  %v459_v39 = vld [vmem:[%s5720_s1 + $0x2b8] sm:$0xff] }
 0x105   : > { %2283 = vmatpush.msra.mxu2 %v5116_v13  ;;  %2335 = vmatpush.msra.mxu3 %v5063_v42  ;;  %5909 = vst [vmem:[#allocation20_spill] sm:$0xff] %v5208_v19  ;;  %v5912_v13 = vand.u32 4294901760, %v5161_v34 }
 0x106   : > { %2084 = vmatmul.f32.gmra.mxu3 %v4833_v2  ;;  %2111 = vmatpush.msra.mxu0 %v5118_v43  ;;  %v2214_v42 = vsub.f32 %v5150_v46, %v5910_v57  ;;  %v5911_v2 = vand.u32 4294901760, %v4849_v26  ;;  %v2209_v53 = vand.u32 4294901760, %v2208_v30  ;;  %v5244_v26 = vsub.f32 %v436_v5, %v5208_v19  ;;  %v5258_v57 = vpop.f32.mrf.mxu1  ;;  %v5260_v5 = vpop.f32.mrf.mxu2 }
 0x107   : > { %2192 = vmatpush.msra.mxu1 %v2191_v49  ;;  %2286 = vmatpush.msra.mxu2 %v5129_v35  ;;  %v2123_v31 = vsub.f32 %v5161_v34, %v5912_v13  ;;  %v2220_v49 = vsub.f32 %v5173_v62, %v5913_v52  ;;  %v5247_v30 = vsub.f32 %v364_v16, %v5213_v28  ;;  %v5249_v13 = vand.u32 4294901760, %v460_v54 }
 0x108   : > { %2337 = vmatpush.msra.mxu3 %v5084_v41  ;;  %1962 = vmatmul.f32.gmra.mxu1 %v5911_v2  ;;  %v699_v16 = vadd.f32 %v4890_v20, %v636_v59  ;;  %v824_v2 = vadd.f32 %v4958_v56, %v743_v61  ;;  %v2215_v52 = vand.u32 4294901760, %v2214_v42  ;;  %v5914_v20 = vand.u32 4294901760, %v5201_v37 }
 0x109   : > { %2113 = vmatpush.msra.mxu0 %v5134_v11  ;;  %2198 = vmatpush.msra.mxu1 %v2197_v44  ;;  %v531_v44 = vadd.f32 %v5071_v38, %v4905_v58  ;;  %v458_v58 = vld [vmem:[%s5720_s1 + $0x2b0] sm:$0xff]  ;;  %v370_v38 = vld [vmem:[%s3813_s17 + $0x80] sm:$0xff]  ;;  %v2221_v42 = vand.u32 4294901760, %v2220_v49  ;;  %v5282_v41 = vsub.f32 %v460_v54, %v5249_v13  ;;  %v5915_v54 = vand.u32 4294901760, %v5227_v55 }
 0x10a   : > { %2289 = vmatpush.msra.mxu2 %v5150_v46  ;;  %2339 = vmatpush.msra.mxu3 %v5090_v8  ;;  %v2124_v8 = vand.u32 4294901760, %v2123_v31  ;;  %v2226_v56 = vsub.f32 %v5201_v37, %v5914_v20  ;;  %v5284_v31 = vpop.f32.mrf.mxu3  ;;  %v5288_v20 = vand.u32 4294901760, %v458_v58  ;;  %v5293_v49 = vand.u32 4294901760, %v370_v38 }
 0x10b   : > { %2115 = vmatpush.msra.mxu0 %v5154_v4  ;;  %2204 = vmatpush.msra.mxu1 %v2203_v33  ;;  %v5276_v33 = vand.u32 4294901760, %v459_v39  ;;  %v749_v59 = vadd.f32 %v4899_v24, %v699_v16  ;;  %v869_v40 = vadd.f32 %v4991_v12, %v824_v2  ;;  %v2232_v61 = vsub.f32 %v5227_v55, %v5915_v54  ;;  %v456_v2 = vld [vmem:[%s5720_s1 + $0x2a0] sm:$0xff] }
 0x10c   : > { %2292 = vmatpush.msra.mxu2 %v5173_v62  ;;  %2341 = vmatpush.msra.mxu3 %v5118_v43  ;;  %v640_v43 = vadd.f32 %v4927_v0, %v531_v44  ;;  %v5916_v24 = vand.u32 4294901760, %v5237_v15  ;;  %v5917_v0 = vand.u32 4294901760, %v5244_v26  ;;  %v5336_v54 = vand.u32 4294901760, %v456_v2 }
 0x10d   : > { %2117 = vmatpush.msra.mxu0 %v5191_v18  ;;  %2210 = vmatpush.msra.mxu1 %v2209_v53  ;;  %v457_v53 = vld [vmem:[%s5720_s1 + $0x2a8] sm:$0xff]  ;;  %v5310_v16 = vsub.f32 %v459_v39, %v5276_v33  ;;  %v5919_v39 = vand.u32 4294901760, %v4949_v21  ;;  %v455_v21 = vld [vmem:[%s5720_s1 + $0x298] sm:$0xff] }
 0x10e   : > { %2295 = vmatpush.msra.mxu2 %v5201_v37  ;;  %2343 = vmatpush.msra.mxu3 %v5134_v11  ;;  %v5301_v11 = vpop.f32.mrf.mxu0  ;;  %v2227_v37 = vand.u32 4294901760, %v2226_v56  ;;  %v2551_v12 = vsub.f32 %v5237_v15, %v5916_v24  ;;  %v2238_v44 = vsub.f32 %v5244_v26, %v5917_v0  ;;  %v5322_v24 = vand.u32 4294901760, %v457_v53 }
 0x10f   : > { %2119 = vmatpush.msra.mxu0 %v5208_v19  ;;  %2216 = vmatpush.msra.mxu1 %v2215_v52  ;;  %v5918_v52 = vand.u32 4294901760, %v5247_v30  ;;  %v918_v0 = vadd.f32 %v4993_v3, %v869_v40  ;;  %v5373_v40 = vsub.f32 %v456_v2, %v5336_v54 }
 0x110   : > { %2298 = vmatpush.msra.mxu2 %v5227_v55  ;;  %2345 = vmatpush.msra.mxu3 %v5154_v4  ;;  %v2552_v3 = vand.u32 4294901760, %v2551_v12  ;;  %v2239_v4 = vand.u32 4294901760, %v2238_v44  ;;  %v5923_v12 = vand.u32 4294901760, %v4977_v51  ;;  %v453_v51 = vld [vmem:[%s5720_s1 + $0x288] sm:$0xff] }
 0x111   : > { %2125 = vmatmul.f32.vlgmr.msra.gmra.mxu0 %v2124_v8  ;;  %2222 = vmatpush.msra.mxu1 %v2221_v42  ;;  %v2131_v56 = vsub.f32 %v5247_v30, %v5918_v52  ;;  %v5328_v8 = vsub.f32 %v458_v58, %v5288_v20  ;;  %v5331_v42 = vsub.f32 %v370_v38, %v5293_v49  ;;  %v2233_v52 = vand.u32 4294901760, %v2232_v61  ;;  %v5348_v61 = vpop.f32.mrf.mxu2 }
 0x112   : > { %2372 = vmatpush.msrb.mxu0 %v5919_v39  ;;  %2301 = vmatpush.msra.mxu2 %v5244_v26  ;;  %v704_v39 = vadd.f32 %v4929_v17, %v640_v43  ;;  %v828_v58 = vadd.f32 %v5031_v7, %v749_v59  ;;  %v5920_v38 = vand.u32 4294901760, %v4964_v10  ;;  %v5921_v43 = vand.u32 4294901760, %v5282_v41 }
 0x113   : > { %2347 = vmatpush.msra.mxu3 %v5191_v18  ;;  %2304 = vmatmul.f32.vlgmr.msra.gmra.mxu2 %v5161_v34  ;;  %v5346_v18 = vpop.f32.mrf.mxu1  ;;  %v2132_v17 = vand.u32 4294901760, %v2131_v56  ;;  %v5356_v7 = vsub.f32 %v457_v53, %v5322_v24  ;;  %v5922_v59 = vand.u32 4294901760, %v5161_v34  ;;  %v1035_v53 = vadd.f32 %v5013_v60, %v918_v0  ;;  %v5375_v34 = vpop.f32.mrf.mxu3 }
 0x114   : > { %2376 = vmatpush.msrb.mxu0 %v5920_v38  ;;  %2228 = vmatpush.msra.mxu1 %v2227_v37  ;;  %v2557_v10 = vsub.f32 %v5282_v41, %v5921_v43  ;;  %v454_v37 = vld [vmem:[%s5720_s1 + $0x290] sm:$0xff]  ;;  %v5367_v38 = vand.u32 4294901760, %v455_v21  ;;  %v359_v43 = vld [vmem:[%s3813_s17 + $0x28] sm:$0xff]  ;;  %v5924_v56 = vand.u32 4294901760, %v4998_v22  ;;  %v5925_v60 = vand.u32 4294901760, %v5310_v16  ;;  %v452_v22 = vld [vmem:[%s5720_s1 + $0x280] sm:$0xff] }
 0x115   : > { %2349 = vmatpush.msra.mxu3 %v5208_v19  ;;  %2498 = vmatpush.msrb.mxu2 %v5204_v14  ;;  %v5387_v2 = vand.u32 4294901760, %v454_v37 }
 0x116   : > { %2353 = vmatmul.f32.vlgmr.msra.gmra.mxu3 %v5922_v59  ;;  %2380 = vmatpush.msrb.mxu0 %v5923_v12  ;;  %v755_v59 = vadd.f32 %v4943_v32, %v704_v39  ;;  %v873_v12 = vadd.f32 %v5075_v47, %v828_v58  ;;  %v2563_v0 = vsub.f32 %v5310_v16, %v5925_v60  ;;  %v2558_v44 = vand.u32 4294901760, %v2557_v10  ;;  %v5390_v19 = vpop.f32.mrf.mxu0 }
 0x117   : > { %2234 = vmatpush.msra.mxu1 %v2233_v52  ;;  %2500 = vmatpush.msrb.mxu2 %v5249_v13  ;;  %v1097_v52 = vadd.f32 %v5210_v48, %v1035_v53  ;;  %v2574_v32 = vand.u32 4294901760, %v5356_v7  ;;  %v468_v47 = vsel %vm466_vm0, %v359_v43, 0  ;;  %v5926_v39 = vand.u32 4294901760, %v5021_v45 }
 0x118   : > { %2384 = vmatpush.msrb.mxu0 %v5924_v56  ;;  %2553 = vmatpush.msrb.mxu3 %v2552_v3  ;;  %v5927_v48 = vand.u32 4294901760, %v5328_v8  ;;  %v5928_v58 = vand.u32 4294901760, %v5331_v42  ;;  %v5409_v10 = vand.u32 4294901760, %v453_v51  ;;  %v5811_v45 = vand.u32 4294901760, %v5373_v40 }
 0x119   : > { %2240 = vmatpush.msra.mxu1 %v2239_v4  ;;  %2133 = vmatmul.f32.gmra.mxu0 %v2132_v17  ;;  %v5407_v17 = vsub.f32 %v455_v21, %v5367_v38  ;;  %v1146_v56 = vadd.f32 %v5258_v57, %v1097_v52  ;;  %v5929_v43 = vand.u32 4294901760, %v5039_v25  ;;  %v2564_v53 = vand.u32 4294901760, %v2563_v0 }
 0x11a   : > { %2242 = vmatmul.f32.vlgmr.msra.gmra.mxu1 %v5131_v6  ;;  %2388 = vmatpush.msrb.mxu0 %v5926_v39  ;;  %v2569_v4 = vsub.f32 %v5328_v8, %v5927_v48  ;;  %v2139_v3 = vsub.f32 %v5331_v42, %v5928_v58  ;;  %v5419_v60 = vsub.f32 %v454_v37, %v5387_v2  ;;  %v5421_v21 = vand.u32 4294901760, %v452_v22 }
 0x11b   : > { %2447 = vmatpush.msrb.mxu1 %v4925_v50  ;;  %2309 = vmatmul.f32.gmra.mxu2 %v5247_v30  ;;  %v5423_v39 = vand.u32 4294901760, %v468_v47  ;;  %v832_v50 = vadd.f32 %v5121_v29, %v755_v59  ;;  %v926_v57 = vadd.f32 %v5077_v1, %v873_v12  ;;  %v2575_v25 = vsub.f32 %v5356_v7, %v2574_v32  ;;  %v5436_v29 = vpop.f32.mrf.mxu1 }
 0x11c   : > { %2392 = vmatpush.msrb.mxu0 %v5929_v43  ;;  %2502 = vmatpush.msrb.mxu2 %v5276_v33  ;;  %v5930_v0 = vand.u32 4294901760, %v5247_v30  ;;  %v5931_v37 = vand.u32 4294901760, %v5051_v23  ;;  %v2570_v52 = vand.u32 4294901760, %v2569_v4  ;;  %v2140_v48 = vand.u32 4294901760, %v2139_v3 }
 0x11d   : > { %2449 = vmatpush.msrb.mxu1 %v4939_v27  ;;  %2559 = vmatpush.msrb.mxu3 %v2558_v44  ;;  %v5810_v58 = vand.u32 4294901760, %v5407_v17  ;;  %v5439_v1 = vsub.f32 %v453_v51, %v5409_v10  ;;  %v5441_v27 = vpop.f32.mrf.mxu2  ;;  %v365_v44 = vld [vmem:[%s3813_s17 + $0x58] sm:$0xff]  ;;  %v1227_v59 = vadd.f32 %v5260_v5, %v1146_v56  ;;  %v2581_v23 = vsub.f32 %v5373_v40, %v5811_v45  ;;  %v5933_v5 = vld [vmem:[#allocation15_spill] sm:$0xff] }
 0x11e   : > { %2359 = vmatmul.f32.gmra.mxu3 %v5930_v0  ;;  %2396 = vmatpush.msrb.mxu0 %v5931_v37  ;;  %v5932_v30 = vand.u32 4294901760, %v5082_v9  ;;  %v5809_v51 = vand.u32 4294901760, %v5419_v60  ;;  %v5454_v12 = vsub.f32 %v468_v47, %v5423_v39  ;;  %v5457_v4 = vsub.f32 %v452_v22, %v5421_v21  ;;  %v5934_v56 = vld [vmem:[#allocation3_spill] sm:$0xff]  ;;  %v1320_v9 = vpop.f32.mrf.mxu0 }
 0x11f   : > { %2451 = vmatpush.msrb.mxu1 %v4951_v63  ;;  %2504 = vmatpush.msrb.mxu2 %v5288_v20  ;;  %v1039_v63 = vadd.f32 %v5101_v36, %v926_v57  ;;  %v877_v3 = vadd.f32 %v5933_v5, %v832_v50  ;;  %v2576_v43 = vand.u32 4294901760, %v2575_v25  ;;  %v471_v0 = vsel %vm466_vm0, %v365_v44, 0  ;;  %v5935_v57 = vld [vmem:[#allocation10_spill] sm:$0xff]  ;;  %v5938_v44 = vld [vmem:[#allocation16_spill] sm:$0xff]  ;;  %v5939_v5 = vld [vmem:[#allocation11_spill] sm:$0xff] }
 0x120   : > { %2565 = vmatpush.msrb.mxu3 %v2564_v53  ;;  %2400 = vmatpush.msrb.mxu0 %v5932_v30  ;;  %v5463_v53 = vpop.f32.mrf.mxu3  ;;  %v2587_v22 = vsub.f32 %v5407_v17, %v5810_v58  ;;  %v2598_v36 = vand.u32 4294901760, %v5439_v1  ;;  %v1272_v50 = vadd.f32 %v5284_v31, %v1227_v59  ;;  %v5936_v25 = vand.u32 4294901760, %v5935_v57  ;;  %v5937_v30 = vld [vmem:[#allocation2_spill] sm:$0xff]  ;;  %v5941_v57 = vld [vmem:[#allocation4_spill] sm:$0xff]  ;;  %v371_v45 = vld [vmem:[%s3813_s17 + $0x88] sm:$0xff] }
 0x121   : > { %2453 = vmatpush.msrb.mxu1 %v5934_v56  ;;  %2506 = vmatpush.msrb.mxu2 %v5322_v24  ;;  %v1102_v47 = vadd.f32 %v5301_v11, %v1039_v63  ;;  %v2582_v37 = vand.u32 4294901760, %v2581_v23  ;;  %v2604_v11 = vand.u32 4294901760, %v5457_v4  ;;  %v5482_v31 = vand.u32 4294901760, %v471_v0 }
 0x122   : > { %2571 = vmatpush.msrb.mxu3 %v2570_v52  ;;  %2141 = vmatmul.f32.gmra.mxu0 %v2140_v48  ;;  %v2593_v52 = vsub.f32 %v5419_v60, %v5809_v51  ;;  %v2519_v48 = vand.u32 4294901760, %v5454_v12  ;;  %v934_v59 = vadd.f32 %v5938_v44, %v877_v3  ;;  %v1321_v23 = vadd.f32 %v1320_v9, %v1272_v50  ;;  %v5945_v44 = vld [vmem:[#allocation5_spill] sm:$0xff] }
 0x123   : > { %2246 = vmatmul.f32.gmra.mxu1 %v5213_v28  ;;  %2404 = vmatpush.msrb.mxu0 %v5936_v25  ;;  %v1152_v63 = vadd.f32 %v5346_v18, %v1102_v47  ;;  %v5940_v56 = vand.u32 4294901760, %v5939_v5  ;;  %v2588_v25 = vand.u32 4294901760, %v2587_v22  ;;  %v5942_v3 = vand.u32 4294901760, %v5331_v42 }
 0x124   : > { %2455 = vmatpush.msrb.mxu1 %v5937_v30  ;;  %2508 = vmatpush.msrb.mxu2 %v5336_v54  ;;  %v2599_v30 = vsub.f32 %v5439_v1, %v2598_v36  ;;  %v2594_v9 = vand.u32 4294901760, %v2593_v52  ;;  %v2520_v22 = vsub.f32 %v5454_v12, %v2519_v48  ;;  %v2605_v47 = vsub.f32 %v5457_v4, %v2604_v11 }
 0x125   : > { %2577 = vmatpush.msrb.mxu3 %v2576_v43  ;;  %2314 = vmatmul.f32.gmra.mxu2 %v5331_v42  ;;  %v5943_v43 = vand.u32 4294901760, %v5129_v35  ;;  %v5506_v50 = vsub.f32 %v471_v0, %v5482_v31  ;;  %v1231_v42 = vadd.f32 %v5348_v61, %v1152_v63  ;;  %v474_v52 = vsel %vm466_vm0, %v371_v45, 0 }
 0x126   : > { %2408 = vmatpush.msrb.mxu0 %v5940_v56  ;;  %2457 = vmatpush.msrb.mxu1 %v5941_v57  ;;  %v1437_v51 = vpop.f32.mrf.mxu1  ;;  %v1499_v58 = vpop.f32.mrf.mxu2  ;;  %v5946_v5 = vand.u32 4294901760, %v5150_v46  ;;  %v2600_v56 = vand.u32 4294901760, %v2599_v30  ;;  %v5947_v57 = vld [vmem:[#allocation6_spill] sm:$0xff]  ;;  %v2606_v45 = vand.u32 4294901760, %v2605_v47  ;;  %v5949_v30 = vld [vmem:[#allocation7_spill] sm:$0xff] }
 0x127   : > { %2510 = vmatpush.msrb.mxu2 %v5367_v38  ;;  %2583 = vmatpush.msrb.mxu3 %v2582_v37  ;;  %v1438_v18 = vadd.f32 %v1437_v51, %v1321_v23  ;;  %v5944_v37 = vld [vmem:[#allocation18_spill] sm:$0xff]  ;;  %v1328_v61 = vpop.f32.mrf.mxu0  ;;  %v2527_v63 = vand.u32 4294901760, %v5506_v50  ;;  %v1276_v46 = vadd.f32 %v5375_v34, %v1231_v42 }
 0x128   : > { %2365 = vmatmul.f32.gmra.mxu3 %v5942_v3  ;;  %2412 = vmatpush.msrb.mxu0 %v5943_v43  ;;  %v1043_v51 = vadd.f32 %v5944_v37, %v934_v59  ;;  %v5950_v3 = vld [vmem:[#allocation19_spill] sm:$0xff]  ;;  %v5953_v37 = vand.u32 4294901760, %v5227_v55 }
 0x129   : > { %2459 = vmatpush.msrb.mxu1 %v5945_v44  ;;  %2512 = vmatpush.msrb.mxu2 %v5387_v2  ;;  %v1500_v35 = vadd.f32 %v1499_v58, %v1438_v18  ;;  %v1548_v23 = vpop.f32.mrf.mxu3  ;;  %v2521_v58 = vand.u32 4294901760, %v2520_v22  ;;  %v5951_v43 = vand.u32 4294901760, %v5950_v3  ;;  %v1329_v22 = vadd.f32 %v1328_v61, %v1276_v46 }
 0x12a   : > { %2589 = vmatpush.msrb.mxu3 %v2588_v25  ;;  %2416 = vmatpush.msrb.mxu0 %v5946_v5  ;;  %v1107_v0 = vadd.f32 %v5390_v19, %v1043_v51  ;;  %v5522_v25 = vand.u32 4294901760, %v474_v52  ;;  %v5948_v19 = vand.u32 4294901760, %v5173_v62  ;;  %v2528_v62 = vsub.f32 %v5506_v50, %v2527_v63  ;;  %v5954_v51 = vld [vmem:[#allocation9_spill] sm:$0xff] }
 0x12b   : > { %2461 = vmatpush.msrb.mxu1 %v5947_v57  ;;  %2514 = vmatpush.msrb.mxu2 %v5409_v10  ;;  %v5518_v59 = vadd.f32 %v1548_v23, %v1500_v35  ;;  %v5955_v35 = vand.u32 4294901760, %v5244_v26  ;;  %v5956_v23 = vld [vmem:[#allocation12_spill] sm:$0xff]  ;;  %v5958_v61 = vand.u32 4294901760, %v5237_v15  ;;  %v5960_v46 = vand.u32 4294901760, %v5282_v41 }
 0x12c   : > { %2595 = vmatpush.msrb.mxu3 %v2594_v9  ;;  %2250 = vmatmul.f32.gmra.mxu1 %v5293_v49  ;;  %v1158_v18 = vadd.f32 %v5436_v29, %v1107_v0  ;;  %v5952_v9 = vld [vmem:[#allocation8_spill] sm:$0xff]  ;;  %v5537_v34 = vsub.f32 %v474_v52, %v5522_v25  ;;  %v2529_v55 = vand.u32 4294901760, %v2528_v62  ;;  %v5957_v0 = vld [vmem:[#allocation13_spill] sm:$0xff] }
 0x12d   : > { %2420 = vmatpush.msrb.mxu0 %v5948_v19  ;;  %2463 = vmatpush.msrb.mxu1 %v5949_v30  ;;  %v5961_v30 = vld [vmem:[#allocation17_spill] sm:$0xff] }
 0x12e   : > { %2516 = vmatpush.msrb.mxu2 %v5421_v21  ;;  %2601 = vmatpush.msrb.mxu3 %v2600_v56  ;;  %v1235_v44 = vadd.f32 %v5441_v27, %v1158_v18  ;;  %v2535_v56 = vand.u32 4294901760, %v5537_v34 }
 0x12f   : > { %2424 = vmatpush.msrb.mxu0 %v5951_v43  ;;  %2465 = vmatpush.msrb.mxu1 %v5952_v9  ;;  %v1336_v27 = vpop.f32.mrf.mxu0  ;;  %v5963_v43 = vld [vmem:[#allocation20_spill] sm:$0xff] }
 0x130   : > { %2522 = vmatmul.f32.vlgmr.msrb.gmra.mxu2 %v2521_v58  ;;  %2607 = vmatpush.msrb.mxu3 %v2606_v45  ;;  %v1441_v47 = vpop.f32.mrf.mxu1  ;;  %v1504_v29 = vpop.f32.mrf.mxu2  ;;  %v1280_v26 = vadd.f32 %v5463_v53, %v1235_v44  ;;  %v5959_v58 = vld [vmem:[#allocation14_spill] sm:$0xff]  ;;  %v2536_v45 = vsub.f32 %v5537_v34, %v2535_v56 }
 0x131   : > { %2428 = vmatpush.msrb.mxu0 %v5953_v37  ;;  %2467 = vmatpush.msrb.mxu1 %v5954_v51  ;;  %v1442_v42 = vadd.f32 %v1441_v47, %v1329_v22 }
 0x132   : > { %2609 = vmatmul.f32.vlgmr.msrb.gmra.mxu3 %v5423_v39  ;;  %2629 = vmatpush.msra.mxu2 %v5237_v15  ;;  %v1337_v19 = vadd.f32 %v1336_v27, %v1280_v26  ;;  %v5962_v15 = vand.u32 4294901760, %v5310_v16 }
 0x133   : > { %2432 = vmatpush.msrb.mxu0 %v5955_v35  ;;  %2469 = vmatpush.msrb.mxu1 %v5956_v23  ;;  %v1505_v52 = vadd.f32 %v1504_v29, %v1442_v42  ;;  %v1554_v5 = vpop.f32.mrf.mxu3 }
 0x134   : > { %2434 = vmatmul.f32.vlgmr.msrb.gmra.mxu0 %v5131_v6  ;;  %2632 = vmatpush.msra.mxu2 %v5282_v41  ;;  %v2537_v41 = vand.u32 4294901760, %v2536_v45 }
 0x135   : > { %2471 = vmatpush.msrb.mxu1 %v5957_v0  ;;  %2680 = vmatpush.msra.mxu3 %v5204_v14  ;;  %v1555_v57 = vadd.f32 %v1554_v5, %v1505_v52 }
 0x136   : > { %2635 = vmatpush.msra.mxu2 %v5310_v16  ;;  %2727 = vmatpush.msra.mxu0 %v5958_v61  ;;  %v5964_v16 = vand.u32 4294901760, %v5328_v8 }
 0x137   : > { %2473 = vmatpush.msrb.mxu1 %v5959_v58  ;;  %2682 = vmatpush.msra.mxu3 %v5249_v13 }
 0x138   : > { %2530 = vmatmul.f32.gmra.mxu2 %v2529_v55  ;;  %2731 = vmatpush.msra.mxu0 %v5960_v46 }
 0x139   : > { %2475 = vmatpush.msrb.mxu1 %v5961_v30  ;;  %2638 = vmatpush.msra.mxu2 %v5328_v8  ;;  %v1445_v53 = vpop.f32.mrf.mxu1 }
 0x13a   : > { %2613 = vmatmul.f32.gmra.mxu3 %v5482_v31  ;;  %2735 = vmatpush.msra.mxu0 %v5962_v15  ;;  %v1446_v18 = vadd.f32 %v1445_v53, %v1337_v19  ;;  %v1509_v3 = vpop.f32.mrf.mxu2 }
 0x13b   : > { %2684 = vmatpush.msra.mxu3 %v5276_v33  ;;  %2477 = vmatpush.msrb.mxu1 %v5963_v43 }
 0x13c   : > { %2438 = vmatmul.f32.gmra.mxu0 %v5213_v28  ;;  %2479 = vmatmul.f32.vlgmr.msrb.gmra.mxu1 %v5131_v6  ;;  %v1510_v9 = vadd.f32 %v1509_v3, %v1446_v18 }
 0x13d   : > { %2641 = vmatpush.msra.mxu2 %v5356_v7  ;;  %2686 = vmatpush.msra.mxu3 %v5288_v20  ;;  %v1560_v22 = vpop.f32.mrf.mxu3 }
 0x13e   : > { %2784 = vmatpush.msra.mxu1 %v5204_v14  ;;  %2739 = vmatpush.msra.mxu0 %v5964_v16  ;;  %v1561_v62 = vadd.f32 %v1560_v22, %v1510_v9 }
 0x13f   : > { %2644 = vmatpush.msra.mxu2 %v5373_v40  ;;  %2688 = vmatpush.msra.mxu3 %v5322_v24 }
 0x140   : > { %2538 = vmatmul.f32.gmra.mxu2 %v2537_v41  ;;  %2786 = vmatpush.msra.mxu1 %v5249_v13  ;;  %v5965_v13 = vand.u32 4294901760, %v5373_v40 }
 0x141   : > { %2647 = vmatpush.msra.mxu2 %v5407_v17  ;;  %2690 = vmatpush.msra.mxu3 %v5336_v54 }
 0x142   : > { %2617 = vmatmul.f32.gmra.mxu3 %v5522_v25  ;;  %2788 = vmatpush.msra.mxu1 %v5276_v33  ;;  %v1629_v14 = vpop.f32.mrf.mxu0 }
 0x143   : > { %2650 = vmatpush.msra.mxu2 %v5419_v60  ;;  %2692 = vmatpush.msra.mxu3 %v5367_v38  ;;  %v1630_v6 = vadd.f32 %v1629_v14, %v5518_v59 }
 0x144   : > { %2442 = vmatmul.f32.gmra.mxu0 %v5293_v49  ;;  %2483 = vmatmul.f32.gmra.mxu1 %v5213_v28  ;;  %v5966_v28 = vand.u32 4294901760, %v5407_v17 }
 0x145   : > { %2653 = vmatpush.msra.mxu2 %v5439_v1  ;;  %2694 = vmatpush.msra.mxu3 %v5387_v2 }
 0x146   : > { %2743 = vmatpush.msra.mxu0 %v2574_v32  ;;  %2790 = vmatpush.msra.mxu1 %v5288_v20  ;;  %v5967_v20 = vand.u32 4294901760, %v5419_v60 }
 0x147   : > { %2656 = vmatpush.msra.mxu2 %v5457_v4  ;;  %2696 = vmatpush.msra.mxu3 %v5409_v10 }
 0x148   : > { %2659 = vmatmul.f32.vlgmr.msra.gmra.mxu2 %v5454_v12  ;;  %2747 = vmatpush.msra.mxu0 %v5965_v13 }
 0x149   : > { %2698 = vmatpush.msra.mxu3 %v5421_v21  ;;  %2792 = vmatpush.msra.mxu1 %v5322_v24 }
 0x14a   : > { %2702 = vmatmul.f32.vlgmr.msra.gmra.mxu3 %v2519_v48  ;;  %2751 = vmatpush.msra.mxu0 %v5966_v28 }
 0x14b   : > { %2794 = vmatpush.msra.mxu1 %v5336_v54  ;;  %v1633_v33 = vpop.f32.mrf.mxu0 }
 0x14c   : > { %2487 = vmatmul.f32.gmra.mxu1 %v5293_v49  ;;  %2755 = vmatpush.msra.mxu0 %v5967_v20  ;;  %v1634_v8 = vadd.f32 %v1633_v33, %v1555_v57  ;;  %v1674_v40 = vpop.f32.mrf.mxu1  ;;  %v1723_v7 = vpop.f32.mrf.mxu2 }
 0x14d   : > { %2796 = vmatpush.msra.mxu1 %v5367_v38  ;;  %v1675_v24 = vadd.f32 %v1674_v40, %v1630_v6 }
 0x14e   : > { %2759 = vmatpush.msra.mxu0 %v2598_v36 }
 0x14f   : > { %2798 = vmatpush.msra.mxu1 %v5387_v2  ;;  %v1724_v32 = vadd.f32 %v1723_v7, %v1675_v24  ;;  %v1840_v17 = vpop.f32.mrf.mxu3 }
 0x150   : > { %2664 = vmatmul.f32.gmra.mxu2 %v5506_v50  ;;  %2763 = vmatpush.msra.mxu0 %v2604_v11 }
 0x151   : > { %2765 = vmatmul.f32.vlgmr.msra.gmra.mxu0 %v5423_v39  ;;  %2800 = vmatpush.msra.mxu1 %v5409_v10  ;;  %v1841_v49 = vadd.f32 %v1840_v17, %v1724_v32 }
 0x152   : > { %2708 = vmatmul.f32.gmra.mxu3 %v2527_v63 }
 0x153   : > { %2802 = vmatpush.msra.mxu1 %v5421_v21 }
 0x154   : > { %2804 = vmatmul.f32.vlgmr.msra.gmra.mxu1 %v5423_v39 }
 0x155   : > { %v1637_v10 = vpop.f32.mrf.mxu0 }
 0x156   : > { %v1678_v54 = vpop.f32.mrf.mxu1  ;;  %v1731_v38 = vpop.f32.mrf.mxu2  ;;  %v1638_v4 = vadd.f32 %v1637_v10, %v1561_v62 }
 0x157   : > { %v1679_v2 = vadd.f32 %v1678_v54, %v1634_v8 }
 0x158   : > { %2669 = vmatmul.f32.gmra.mxu2 %v5537_v34 }
 0x159   : > { %2769 = vmatmul.f32.gmra.mxu0 %v5482_v31  ;;  %v1732_v60 = vadd.f32 %v1731_v38, %v1679_v2  ;;  %v1844_v1 = vpop.f32.mrf.mxu3 }
 0x15a   : > { %2714 = vmatmul.f32.gmra.mxu3 %v2535_v56 }
 0x15b   : > { %v1845_v12 = vadd.f32 %v1844_v1, %v1732_v60 }
 0x15c   : > { %2808 = vmatmul.f32.gmra.mxu1 %v5482_v31 }
 0x15f   : > { %v1682_v21 = vpop.f32.mrf.mxu1 }
 0x160   : > { %v1683_v36 = vadd.f32 %v1682_v21, %v1638_v4  ;;  %v1739_v39 = vpop.f32.mrf.mxu2 }
 0x161   : > { %2773 = vmatmul.f32.gmra.mxu0 %v5522_v25 }
 0x162   : > { %v1740_v48 = vadd.f32 %v1739_v39, %v1683_v36 }
 0x163   : > { %v1848_v11 = vpop.f32.mrf.mxu3 }
 0x164   : > { %2812 = vmatmul.f32.gmra.mxu1 %v5522_v25  ;;  %v1849_v50 = vadd.f32 %v1848_v11, %v1740_v48 }
 0x168   : > { %v1902_v59 = vpop.f32.mrf.mxu0 }
 0x169   : > { %v1903_v63 = vadd.f32 %v1902_v59, %v1841_v49 }
 0x171   : > { %v1907_v31 = vpop.f32.mrf.mxu0 }
 0x172   : > { %v1951_v47 = vpop.f32.mrf.mxu1  ;;  %v2032_v34 = vpop.f32.mrf.mxu2  ;;  %v1908_v53 = vadd.f32 %v1907_v31, %v1845_v12 }
 0x173   : > { %v1952_v29 = vadd.f32 %v1951_v47, %v1903_v63 }
 0x175   : > { %v2033_v37 = vadd.f32 %v2032_v34, %v1952_v29  ;;  %v2077_v51 = vpop.f32.mrf.mxu3 }
 0x177   : > { %v2078_v42 = vadd.f32 %v2077_v51, %v2033_v37 }
 0x17b   : > { %v1912_v52 = vpop.f32.mrf.mxu0 }
 0x17c   : > { %v2036_v44 = vpop.f32.mrf.mxu2  ;;  %v1957_v23 = vpop.f32.mrf.mxu1  ;;  %v1913_v16 = vadd.f32 %v1912_v52, %v1849_v50 }
 0x17d   : > { %v1958_v18 = vadd.f32 %v1957_v23, %v1908_v53 }
 0x17f   : > { %v2081_v35 = vpop.f32.mrf.mxu3  ;;  %v2037_v9 = vadd.f32 %v2036_v44, %v1958_v18 }
 0x181   : > { %v2082_v6 = vadd.f32 %v2081_v35, %v2037_v9  ;;  %v2824_v9 = vld [vmem:[%s5723_s4 + $0x10] sm:$0xff] }
 0x185   : > { %v1963_v56 = vpop.f32.mrf.mxu1 }
 0x186   : > { %v2040_v5 = vpop.f32.mrf.mxu2  ;;  %v1964_v13 = vadd.f32 %v1963_v56, %v1913_v16 }
 0x188   : > { %v2041_v7 = vadd.f32 %v2040_v5, %v1964_v13  ;;  %v2819_v5 = vld [vmem:[%s5722_s3] sm:$0xff]  ;;  %v3523_v13 = vmov 0  }
 0x189   : > { %v2085_v55 = vpop.f32.mrf.mxu3  ;;  %3497 = vset.pattern.permute.xlu1 %v3523_v13  ;;  %3496 = vset.pattern.permute.xlu0 %v3523_v13 }
 0x18a   : > { %v2086_v49 = vadd.f32 %v2085_v55, %v2041_v7  ;;  %2837 = vperm.xlu0 %3496, %v2824_v9  }
 0x18e   : > { %v2126_v0 = vpop.f32.mrf.mxu0 }
 0x18f   : > { %v2127_v22 = vadd.f32 %v2126_v0, %v2078_v42 }
 0x196   : > { %v2305_v27 = vpop.f32.mrf.mxu2  ;;  %v2134_v61 = vpop.f32.mrf.mxu0 }
 0x197   : > { %v2243_v57 = vpop.f32.mrf.mxu1  ;;  %v2135_v33 = vadd.f32 %v2134_v61, %v2082_v6 }
 0x198   : > { %v2244_v62 = vadd.f32 %v2243_v57, %v2127_v22  ;;  %v2822_v22 = vld [vmem:[%s5723_s4] sm:$0xff] }
 0x199   : > { %v2354_v25 = vpop.f32.mrf.mxu3  ;;  %2827 = vperm.xlu1 %3497, %v2822_v22  }
 0x19a   : > { %v2306_v20 = vadd.f32 %v2305_v27, %v2244_v62 }
 0x19c   : > { %v2355_v32 = vadd.f32 %v2354_v25, %v2306_v20 }
 0x19e   : > { %v2310_v26 = vpop.f32.mrf.mxu2 }
 0x19f   : > { %v2142_v19 = vpop.f32.mrf.mxu0 }
 0x1a0   : > { %v2247_v45 = vpop.f32.mrf.mxu1  ;;  %v2143_v60 = vadd.f32 %v2142_v19, %v2086_v49 }
 0x1a1   : > { %v2360_v58 = vpop.f32.mrf.mxu3  ;;  %v2248_v24 = vadd.f32 %v2247_v45, %v2135_v33 }
 0x1a3   : > { %v2311_v54 = vadd.f32 %v2310_v26, %v2248_v24  ;;  %v2842_v26 = vsel %vm2840_vm1, %v2819_v5, 0 }
 0x1a4   : > { %v5634_v45 = vand.u32 4294901760, %v2842_v26 }
 0x1a5   : > { %v2361_v12 = vadd.f32 %v2360_v58, %v2311_v54 }
 0x1a8   : > { %v2315_v46 = vpop.f32.mrf.mxu2 }
 0x1a9   : > { %v2251_v15 = vpop.f32.mrf.mxu1 }
 0x1aa   : > { %v2252_v4 = vadd.f32 %v2251_v15, %v2143_v60  ;;  %v2820_v15 = vld [vmem:[%s5722_s3 + $0x8] sm:$0xff] }
 0x1ab   : > { %v2366_v30 = vpop.f32.mrf.mxu3  ;;  %v2845_v6 = vsel %vm2840_vm1, %v2820_v15, 0 }
 0x1ac   : > { %v2316_v11 = vadd.f32 %v2315_v46, %v2252_v4 }
 0x1ae   : > { %v2367_v34 = vadd.f32 %v2366_v30, %v2316_v11 }
 0x1b1   : > { %v2435_v3 = vpop.f32.mrf.mxu0 }
 0x1b2   : > { %v2436_v38 = vadd.f32 %v2435_v3, %v2355_v32  ;;  %v2821_v32 = vld [vmem:[%s5722_s3 + $0x10] sm:$0xff] }
 0x1b3   : > { %v2523_v43 = vpop.f32.mrf.mxu2 }
 0x1b5   : > { %v2610_v41 = vpop.f32.mrf.mxu3 }
 0x1b9   : > { %v2480_v14 = vpop.f32.mrf.mxu1  ;;  %v2439_v8 = vpop.f32.mrf.mxu0 }
 0x1ba   : > { %v2481_v1 = vadd.f32 %v2480_v14, %v2436_v38  ;;  %v2440_v36 = vadd.f32 %v2439_v8, %v2361_v12 }
 0x1bb   : > { %v2531_v28 = vpop.f32.mrf.mxu2 }
 0x1bc   : > { %v2524_v39 = vadd.f32 %v2523_v43, %v2481_v1 }
 0x1bd   : > { %v2614_v40 = vpop.f32.mrf.mxu3 }
 0x1be   : > { %v2611_v63 = vadd.f32 %v2610_v41, %v2524_v39  ;;  %v2870_v41 = vsub.f32 %v2842_v26, %v5634_v45 }
 0x1c0   : > { %v2871_v8 = vand.u32 4294901760, %v2870_v41 }
 0x1c1   : > { %v2484_v17 = vpop.f32.mrf.mxu1  ;;  %v2443_v21 = vpop.f32.mrf.mxu0 }
 0x1c2   : > { %v2485_v50 = vadd.f32 %v2484_v17, %v2440_v36  ;;  %v2444_v42 = vadd.f32 %v2443_v21, %v2367_v34  ;;  %v2872_v54 = vsub.f32 %v2870_v41, %v2871_v8 }
 0x1c3   : > { %v2539_v2 = vpop.f32.mrf.mxu2 }
 0x1c4   : > { %v2532_v29 = vadd.f32 %v2531_v28, %v2485_v50  ;;  %v2873_v21 = vand.u32 4294901760, %v2872_v54 }
 0x1c5   : > { %v2618_v10 = vpop.f32.mrf.mxu3 }
 0x1c6   : > { %v2615_v23 = vadd.f32 %v2614_v40, %v2532_v29  ;;  %v5652_v40 = vand.u32 4294901760, %v2845_v6 }
 0x1c8   : > { %v2878_v38 = vsub.f32 %v2845_v6, %v5652_v40 }
 0x1c9   : > { %v2488_v48 = vpop.f32.mrf.mxu1 }
 0x1ca   : > { %v2489_v44 = vadd.f32 %v2488_v48, %v2444_v42  ;;  %v2879_v36 = vand.u32 4294901760, %v2878_v38 }
 0x1cb   : > { %v2660_v59 = vpop.f32.mrf.mxu2 }
 0x1cc   : > { %v2661_v37 = vadd.f32 %v2660_v59, %v2611_v63  ;;  %v2540_v0 = vadd.f32 %v2539_v2, %v2489_v44  ;;  %v2823_v2 = vld [vmem:[%s5723_s4 + $0x8] sm:$0xff]  ;;  %v2880_v63 = vsub.f32 %v2878_v38, %v2879_v36 }
 0x1cd   : > { %v2703_v47 = vpop.f32.mrf.mxu3  ;;  %2832 = vperm.xlu0 %3496, %v2823_v2  }
 0x1ce   : > { %v2766_v51 = vpop.f32.mrf.mxu0  ;;  %v2704_v35 = vadd.f32 %v2703_v47, %v2661_v37  ;;  %v2619_v30 = vadd.f32 %v2618_v10, %v2540_v0  ;;  %v2848_v10 = vsel %vm2840_vm1, %v2821_v32, 0 }
 0x1cf   : > { %v2885_v39 = vand.u32 4294901760, %v2848_v10 }
 0x1d0   : > { %v2767_v27 = vadd.f32 %v2766_v51, %v2704_v35  ;;  %v2881_v51 = vand.u32 4294901760, %v2880_v63 }
 0x1d1   : > { %v2805_v31 = vpop.f32.mrf.mxu1  ;;  %v2886_v47 = vsub.f32 %v2848_v10, %v2885_v39 }
 0x1d2   : > { %v2806_v46 = vadd.f32 %v2805_v31, %v2767_v27 }
 0x1d3   : > { %v2665_v52 = vpop.f32.mrf.mxu2  ;;  %v2887_v42 = vand.u32 4294901760, %v2886_v47 }
 0x1d4   : > { %v2666_v55 = vadd.f32 %v2665_v52, %v2615_v23  ;;  %v5648_v16 = vmax.f32 %v2806_v46, 0.0  ;;  %v3161_v23 = vld [vmem:[%s5725_s6] sm:$0x3f] }
 0x1d5   : > { %v2709_v56 = vpop.f32.mrf.mxu3  ;;  %v2888_v44 = vsub.f32 %v2886_v47, %v2887_v42  ;;  %3164 = vperm.xlu1 %3497, %v3161_v23  }
 0x1d6   : > { %v2710_v25 = vadd.f32 %v2709_v56, %v2666_v55  ;;  %v2770_v57 = vpop.f32.mrf.mxu0  ;;  %v2867_v7 = vand.u32 4294901760, %v5648_v16 }
 0x1d7   : > { %v2889_v35 = vand.u32 4294901760, %v2888_v44 }
 0x1d8   : > { %v2771_v61 = vadd.f32 %v2770_v57, %v2710_v25  ;;  %v2920_v1 = vsub.f32 %v5648_v16, %v2867_v7 }
 0x1d9   : > { %v2809_v58 = vpop.f32.mrf.mxu1 }
 0x1da   : > { %v2810_v19 = vadd.f32 %v2809_v58, %v2771_v61  ;;  %v2921_v11 = vand.u32 4294901760, %v2920_v1 }
 0x1db   : > { %v2670_v53 = vpop.f32.mrf.mxu2 }
 0x1dc   : > { %v5639_v18 = vmax.f32 %v2810_v19, 0.0  ;;  %v2671_v3 = vadd.f32 %v2670_v53, %v2619_v30  ;;  %v2922_v29 = vsub.f32 %v2920_v1, %v2921_v11 }
 0x1dd   : > { %v2715_v43 = vpop.f32.mrf.mxu3 }
 0x1de   : > { %v2716_v62 = vadd.f32 %v2715_v43, %v2671_v3  ;;  %v2774_v14 = vpop.f32.mrf.mxu0  ;;  %v2865_v28 = vand.u32 4294901760, %v5639_v18  ;;  %v2923_v31 = vand.u32 4294901760, %v2922_v29 }
 0x1e0   : > { %v2775_v33 = vadd.f32 %v2774_v14, %v2716_v62  ;;  %v2914_v49 = vsub.f32 %v5639_v18, %v2865_v28 }
 0x1e1   : > { %v2813_v20 = vpop.f32.mrf.mxu1 }
 0x1e2   : > { %v2814_v24 = vadd.f32 %v2813_v20, %v2775_v33  ;;  %v2915_v4 = vand.u32 4294901760, %v2914_v49 }
 0x1e4   : > { %v5658_v17 = vmax.f32 %v2814_v24, 0.0  ;;  %v2916_v59 = vsub.f32 %v2914_v49, %v2915_v4 }
 0x1e6   : > { %v2863_v60 = vand.u32 4294901760, %v5658_v17  ;;  %v2917_v37 = vand.u32 4294901760, %v2916_v59 }
 0x1e8   : > { %v2908_v12 = vsub.f32 %v5658_v17, %v2863_v60  ;;  %2864 = vmatpush.msrb.mxu2 %v2863_v60  ;;  %2990 = vmatpush.msrb.mxu1 %v2863_v60 }
 0x1ea   : > { %2866 = vmatpush.msrb.mxu2 %v2865_v28  ;;  %2953 = vmatpush.msrb.mxu0 %v2908_v12  ;;  %v2909_v48 = vand.u32 4294901760, %v2908_v12 }
 0x1eb   : > { %2992 = vmatpush.msrb.mxu1 %v2865_v28 }
 0x1ec   : > { %2868 = vmatpush.msrb.mxu2 %v2867_v7  ;;  %2956 = vmatpush.msrb.mxu0 %v2914_v49  ;;  %v2910_v50 = vsub.f32 %v2908_v12, %v2909_v48 }
 0x1ed   : > { %2994 = vmatpush.msrb.mxu1 %v2867_v7  ;;  %2874 = vmatmul.f32.vlgmr.msrb.gmra.mxu2 %v2873_v21 }
 0x1ee   : > { %3030 = vmatpush.msra.mxu2 %v2909_v48  ;;  %2959 = vmatpush.msrb.mxu0 %v2920_v1  ;;  %v2911_v34 = vand.u32 4294901760, %v2910_v50 }
 0x1ef   : > { %2962 = vmatmul.f32.vlgmr.msrb.gmra.mxu0 %v2870_v41  ;;  %2998 = vmatmul.f32.vlgmr.msrb.gmra.mxu1 %v2871_v8 }
 0x1f0   : > { %3034 = vmatpush.msra.mxu2 %v2915_v4  ;;  %2912 = vmatpush.msrb.mxu3 %v2911_v34 }
 0x1f2   : > { %3038 = vmatpush.msra.mxu2 %v2921_v11  ;;  %2918 = vmatpush.msrb.mxu3 %v2917_v37 }
 0x1f4   : > { %2924 = vmatpush.msrb.mxu3 %v2923_v31 }
 0x1f5   : > { %2882 = vmatmul.f32.gmra.mxu2 %v2881_v51  ;;  %2926 = vmatmul.f32.vlgmr.msrb.gmra.mxu3 %v5634_v45 }
 0x1f6   : > { %3066 = vmatpush.msra.mxu3 %v2863_v60 }
 0x1f7   : > { %2967 = vmatmul.f32.gmra.mxu0 %v2878_v38  ;;  %3004 = vmatmul.f32.gmra.mxu1 %v2879_v36 }
 0x1f8   : > { %3068 = vmatpush.msra.mxu3 %v2865_v28 }
 0x1fa   : > { %3070 = vmatpush.msra.mxu3 %v2867_v7 }
 0x1fc   : > { %v2838_v56 = vpop.permute.xlu0 %2837 }
 0x1fd   : > { %2890 = vmatmul.f32.gmra.mxu2 %v2889_v35  ;;  %2930 = vmatmul.f32.gmra.mxu3 %v5652_v40 }
 0x1ff   : > { %2972 = vmatmul.f32.gmra.mxu0 %v2886_v47  ;;  %3010 = vmatmul.f32.gmra.mxu1 %v2887_v42 }
 0x205   : > { %2934 = vmatmul.f32.gmra.mxu3 %v2885_v39  ;;  %3040 = vmatmul.f32.vlgmr.msra.gmra.mxu2 %v5634_v45 }
 0x20b   : > { %v2828_v0 = vpop.permute.xlu1 %2827 }
 0x20d   : > { %3044 = vmatmul.f32.gmra.mxu2 %v5652_v40  ;;  %3072 = vmatmul.f32.vlgmr.msra.gmra.mxu3 %v5634_v45 }
 0x215   : > { %3048 = vmatmul.f32.gmra.mxu2 %v2885_v39  ;;  %3076 = vmatmul.f32.gmra.mxu3 %v5652_v40 }
 0x21d   : > { %3080 = vmatmul.f32.gmra.mxu3 %v2885_v39 }
 0x23f   : > { %v2833_v46 = vpop.permute.xlu0 %2832 }
 0x26c   : > { %v2963_v26 = vpop.f32.mrf.mxu0  ;;  %v2999_v58 = vpop.f32.mrf.mxu1 }
 0x270   : > { %v2875_v52 = vpop.f32.mrf.mxu2 }
 0x271   : > { %v2876_v57 = vadd.f32 %v2875_v52, %v2828_v0 }
 0x274   : > { %v2968_v15 = vpop.f32.mrf.mxu0  ;;  %v3005_v9 = vpop.f32.mrf.mxu1 }
 0x278   : > { %v2883_v5 = vpop.f32.mrf.mxu2  ;;  %v2927_v55 = vpop.f32.mrf.mxu3 }
 0x279   : > { %v2928_v61 = vadd.f32 %v2927_v55, %v2876_v57  ;;  %v2884_v45 = vadd.f32 %v2883_v5, %v2833_v46 }
 0x27b   : > { %v2964_v53 = vadd.f32 %v2963_v26, %v2928_v61 }
 0x27c   : > { %v2973_v40 = vpop.f32.mrf.mxu0  ;;  %v3011_v54 = vpop.f32.mrf.mxu1 }
 0x27d   : > { %v3000_v3 = vadd.f32 %v2999_v58, %v2964_v53  ;;  %v3160_v58 = vld [vmem:[%s5724_s5] sm:$0x3f] }
 0x280   : > { %v2891_v27 = vpop.f32.mrf.mxu2  ;;  %v2931_v25 = vpop.f32.mrf.mxu3 }
 0x281   : > { %v2932_v43 = vadd.f32 %v2931_v25, %v2884_v45  ;;  %v2892_v62 = vadd.f32 %v2891_v27, %v2838_v56 }
 0x283   : > { %v2969_v14 = vadd.f32 %v2968_v15, %v2932_v43  ;;  %v3168_v15 = vsel %vm2840_vm1, %v3160_v58, 0 }
 0x285   : > { %v3006_v33 = vadd.f32 %v3005_v9, %v2969_v14  ;;  %v3189_v14 = vand.u32 4294901760, %v3168_v15 }
 0x288   : > { %v2935_v19 = vpop.f32.mrf.mxu3  ;;  %v3041_v30 = vpop.f32.mrf.mxu2 }
 0x289   : > { %v3042_v41 = vadd.f32 %v3041_v30, %v3000_v3  ;;  %v2936_v20 = vadd.f32 %v2935_v19, %v2892_v62 }
 0x28b   : > { %v2974_v32 = vadd.f32 %v2973_v40, %v2936_v20  ;;  %v3190_v40 = vsub.f32 %v3168_v15, %v3189_v14 }
 0x28d   : > { %v3012_v1 = vadd.f32 %v3011_v54, %v2974_v32 }
 0x290   : > { %v3073_v22 = vpop.f32.mrf.mxu3  ;;  %v3045_v13 = vpop.f32.mrf.mxu2 }
 0x291   : > { %v3074_v6 = vadd.f32 %v3073_v22, %v3042_v41  ;;  %v3046_v7 = vadd.f32 %v3045_v13, %v3006_v33 }
 0x293   : > { %v3084_v28 = vsub.f32 0.0, %v3074_v6  ;;  %v3141_v55 = vmax.f32 %v3074_v6, 0.0 }
 0x295   : > { %v3087_v8 = vmul.f32 1.442695, %v3084_v28 }
 0x297   : > { %3499 = vpow2.f32 %v3087_v8 }
 0x298   : > { %v3077_v24 = vpop.f32.mrf.mxu3  ;;  %v3049_v2 = vpop.f32.mrf.mxu2 }
 0x299   : > { %v5678_v49 = vadd.f32 %v3077_v24, %v3046_v7  ;;  %v3050_v4 = vadd.f32 %v3049_v2, %v3012_v1 }
 0x29b   : > { %v3085_v38 = vsub.f32 0.0, %v5678_v49  ;;  %v3142_v43 = vmax.f32 %v5678_v49, 0.0 }
 0x29d   : > { %v3500_v60 = vpop.eup %3499  ;;  %v3089_v10 = vmul.f32 1.442695, %v3085_v38  ;;  %v3191_v38 = vand.u32 4294901760, %v3190_v40 }
 0x29e   : > { %v3093_v12 = vadd.f32 1.0, %v3500_v60 }
 0x29f   : > { %3501 = vpow2.f32 %v3089_v10 }
 0x2a0   : > { %3503 = vrcp.f32 %v3093_v12  ;;  %v3081_v21 = vpop.f32.mrf.mxu3  ;;  %v3107_v34 = vand.u32 2147483648, %v3093_v12  ;;  %v3105_v37 = vand.u32 2147483647, %v3093_v12  ;;  %vm3101_vm3 = vweird.f32 %v3093_v12 }
 0x2a1   : > { %v5681_v36 = vadd.f32 %v3081_v21, %v3050_v4 }
 0x2a2   : > { %v3108_v44 = vor.u32 1.1754944e-38, %v3107_v34  ;;  %vm3106_vm5 = vcmp.eq.f32.partialorder %v3105_v37, 8.507059e+37 }
 0x2a3   : > { %v3086_v39 = vsub.f32 0.0, %v5681_v36  ;;  %v3143_v32 = vmax.f32 %v5681_v36, 0.0 }
 0x2a5   : > { %v3502_v48 = vpop.eup %3501  ;;  %v3091_v11 = vmul.f32 1.442695, %v3086_v39 }
 0x2a6   : > { %v3504_v50 = vpop.eup %3503  ;;  %v3094_v59 = vadd.f32 1.0, %v3502_v48 }
 0x2a7   : > { %v3097_v63 = vmul.f32 %v3504_v50, %v3093_v12  ;;  %3505 = vpow2.f32 %v3091_v11  ;;  %vm3102_vm2 = vweird.f32 %v3504_v50  ;;  %v3192_v12 = vsub.f32 %v3190_v40, %v3191_v38 }
 0x2a8   : > { %3507 = vrcp.f32 %v3094_v59  ;;  %vm3103_vm4 = vmor %vm3101_vm3, %vm3102_vm2  ;;  %v3120_v27 = vand.u32 2147483647, %v3094_v59  ;;  %v3122_v25 = vand.u32 2147483648, %v3094_v59  ;;  %vm3116_vm8 = vweird.f32 %v3094_v59 }
 0x2a9   : > { %v3098_v47 = vsub.f32 1.0, %v3097_v63  ;;  %v3193_v11 = vand.u32 4294901760, %v3192_v12 }
 0x2aa   : > { %v3123_v53 = vor.u32 1.1754944e-38, %v3122_v25  ;;  %vm3121_vm10 = vcmp.eq.f32.partialorder %v3120_v27, 8.507059e+37 }
 0x2ab   : > { %v3099_v29 = vmul.f32 %v3504_v50, %v3098_v47 }
 0x2ad   : > { %v3506_v51 = vpop.eup %3505  ;;  %v3100_v42 = vadd.f32 %v3504_v50, %v3099_v29 }
 0x2ae   : > { %v3508_v31 = vpop.eup %3507  ;;  %v3095_v35 = vadd.f32 1.0, %v3506_v51 }
 0x2af   : > { %v3104_v23 = vsel %vm3103_vm4, %v3504_v50, %v3100_v42  ;;  %v3112_v52 = vmul.f32 %v3508_v31, %v3094_v59  ;;  %vm3117_vm6 = vweird.f32 %v3508_v31  ;;  %v3165_v42 = vpop.permute.xlu1 %3164 }
 0x2b0   : > { %v3109_v5 = vsel %vm3106_vm5, %v3108_v44, %v3104_v23  ;;  %3509 = vrcp.f32 %v3095_v35  ;;  %vm3118_vm9 = vmor %vm3116_vm8, %vm3117_vm6  ;;  %v3135_v22 = vand.u32 2147483647, %v3095_v35  ;;  %v3137_v62 = vand.u32 2147483648, %v3095_v35 }
 0x2b1   : > { %v3147_v56 = vsub.f32 1.0, %v3109_v5  ;;  %v3113_v0 = vsub.f32 1.0, %v3112_v52  ;;  %v3144_v57 = vmul.f32 %v3141_v55, %v3109_v5  ;;  %vm3131_vm12 = vweird.f32 %v3095_v35 }
 0x2b2   : > { %v3138_v8 = vor.u32 1.1754944e-38, %v3137_v62  ;;  %vm3136_vm14 = vcmp.eq.f32.partialorder %v3135_v22, 8.507059e+37 }
 0x2b3   : > { %v3150_v26 = vmul.f32 %v3147_v56, %v5648_v16  ;;  %v3114_v61 = vmul.f32 %v3508_v31, %v3113_v0 }
 0x2b5   : > { %v3153_v46 = vadd.f32 %v3150_v26, %v3144_v57  ;;  %v3115_v19 = vadd.f32 %v3508_v31, %v3114_v61 }
 0x2b6   : > { %v3510_v30 = vpop.eup %3509 }
 0x2b7   : > { %3157 = vst.msk [vmem:[%s5689_s13] sm:$0xff] %vm3156_vm7, %v3153_v46  ;;  %v3119_v16 = vsel %vm3118_vm9, %v3508_v31, %v3115_v19  ;;  %v3127_v45 = vmul.f32 %v3510_v30, %v3095_v35  ;;  %vm3132_vm11 = vweird.f32 %v3510_v30  ;;  %v3187_v60 = vand.u32 4294901760, %v3153_v46 }
 0x2b8   : > { %v3124_v3 = vsel %vm3121_vm10, %v3123_v53, %v3119_v16  ;;  %vm3133_vm13 = vmor %vm3131_vm12, %vm3132_vm11 }
 0x2b9   : > { %v3148_v41 = vsub.f32 1.0, %v3124_v3  ;;  %v3128_v9 = vsub.f32 1.0, %v3127_v45  ;;  %v3145_v6 = vmul.f32 %v3142_v43, %v3124_v3  ;;  %v3224_v21 = vsub.f32 %v3153_v46, %v3187_v60 }
 0x2bb   : > { %v3151_v13 = vmul.f32 %v3148_v41, %v5639_v18  ;;  %v3129_v28 = vmul.f32 %v3510_v30, %v3128_v9  ;;  %v3225_v50 = vand.u32 4294901760, %v3224_v21 }
 0x2bd   : > { %v3154_v33 = vadd.f32 %v3151_v13, %v3145_v6  ;;  %v3130_v20 = vadd.f32 %v3510_v30, %v3129_v28  ;;  %v3226_v47 = vsub.f32 %v3224_v21, %v3225_v50 }
 0x2bf   : > { %3158 = vst.msk [vmem:[%s5689_s13 + $0x8] sm:$0xff] %vm3156_vm7, %v3154_v33  ;;  %v3134_v7 = vsel %vm3133_vm13, %v3510_v30, %v3130_v20  ;;  %v3185_v54 = vand.u32 4294901760, %v3154_v33  ;;  %v3227_v29 = vand.u32 4294901760, %v3226_v47 }
 0x2c0   : > { %v3139_v24 = vsel %vm3136_vm14, %v3138_v8, %v3134_v7 }
 0x2c1   : > { %v3149_v49 = vsub.f32 1.0, %v3139_v24  ;;  %v3146_v18 = vmul.f32 %v3143_v32, %v3139_v24  ;;  %v3218_v10 = vsub.f32 %v3154_v33, %v3185_v54 }
 0x2c3   : > { %v3152_v2 = vmul.f32 %v3149_v49, %v5658_v17  ;;  %v3219_v48 = vand.u32 4294901760, %v3218_v10 }
 0x2c5   : > { %v3155_v1 = vadd.f32 %v3152_v2, %v3146_v18  ;;  %v3220_v63 = vsub.f32 %v3218_v10, %v3219_v48 }
 0x2c7   : > { %3159 = vst.msk [vmem:[%s5689_s13 + $0x10] sm:$0xff] %vm3156_vm7, %v3155_v1  ;;  %v3183_v4 = vand.u32 4294901760, %v3155_v1  ;;  %v3221_v34 = vand.u32 4294901760, %v3220_v63 }
 0x2c9   : > { %3184 = vmatpush.msra.mxu0 %v3183_v4  ;;  %v3212_v39 = vsub.f32 %v3155_v1, %v3183_v4 }
 0x2cb   : > { %3186 = vmatpush.msra.mxu0 %v3185_v54  ;;  %v3213_v36 = vand.u32 4294901760, %v3212_v39 }
 0x2cd   : > { %3188 = vmatpush.msra.mxu0 %v3187_v60  ;;  %v3214_v59 = vsub.f32 %v3212_v39, %v3213_v36 }
 0x2ce   : > { %3194 = vmatmul.f32.vlgmr.msra.gmra.mxu0 %v3193_v11 }
 0x2cf   : > { %3249 = vmatpush.msrb.mxu0 %v3212_v39  ;;  %v3215_v17 = vand.u32 4294901760, %v3214_v59 }
 0x2d1   : > { %3252 = vmatpush.msrb.mxu0 %v3218_v10  ;;  %3216 = vmatpush.msra.mxu1 %v3215_v17 }
 0x2d3   : > { %3255 = vmatpush.msrb.mxu0 %v3224_v21  ;;  %3222 = vmatpush.msra.mxu1 %v3221_v34 }
 0x2d5   : > { %3304 = vmatpush.msra.mxu0 %v3213_v36  ;;  %3228 = vmatpush.msra.mxu1 %v3227_v29 }
 0x2d6   : > { %3230 = vmatmul.f32.vlgmr.msra.gmra.mxu1 %v3189_v14  ;;  %3258 = vmatmul.f32.vlgmr.msrb.gmra.mxu0 %v3190_v40 }
 0x2d7   : > { %3308 = vmatpush.msra.mxu0 %v3219_v48  ;;  %3276 = vmatpush.msrb.mxu1 %v3183_v4 }
 0x2d9   : > { %3312 = vmatpush.msra.mxu0 %v3225_v50  ;;  %3278 = vmatpush.msrb.mxu1 %v3185_v54 }
 0x2db   : > { %3280 = vmatpush.msrb.mxu1 %v3187_v60 }
 0x2dd   : > { %3332 = vmatpush.msra.mxu1 %v3183_v4 }
 0x2de   : > { %3284 = vmatmul.f32.vlgmr.msrb.gmra.mxu1 %v3191_v38  ;;  %3314 = vmatmul.f32.vlgmr.msra.gmra.mxu0 %v3189_v14 }
 0x2df   : > { %3334 = vmatpush.msra.mxu1 %v3185_v54 }
 0x2e1   : > { %3336 = vmatpush.msra.mxu1 %v3187_v60 }
 0x2e6   : > { %3338 = vmatmul.f32.vlgmr.msra.gmra.mxu1 %v3189_v14 }
 0x34b   : > { %v3195_v37 = vpop.f32.mrf.mxu0 }
 0x34c   : > { %v3196_v44 = vadd.f32 %v3195_v37, %v3165_v42 }
 0x353   : > { %v3231_v51 = vpop.f32.mrf.mxu1  ;;  %v3259_v31 = vpop.f32.mrf.mxu0 }
 0x354   : > { %v3232_v35 = vadd.f32 %v3231_v51, %v3196_v44 }
 0x356   : > { %v3260_v52 = vadd.f32 %v3259_v31, %v3232_v35 }
 0x35b   : > { %v3285_v23 = vpop.f32.mrf.mxu1  ;;  %v3315_v55 = vpop.f32.mrf.mxu0 }
 0x35c   : > { %v3286_v5 = vadd.f32 %v3285_v23, %v3260_v52 }
 0x35e   : > { %v3316_v56 = vadd.f32 %v3315_v55, %v3286_v5 }
 0x363   : > { %v3339_v0 = vpop.f32.mrf.mxu1 }
 0x364   : > { %v3340_v27 = vadd.f32 %v3339_v0, %v3316_v56 }
 0x366   : > { %v3344_v25 = vsel %vm3342_vm15, %v3340_v27, -inf  ;;  %3343 = vst.msk [vmem:[%s349_s19] sm:$0x3f] %vm3342_vm15, %v3340_v27 }
 0x367   : > { %3345 = vmax.xlane.f32.xlu2 %v3344_v25 }
 0x3da   : > { %v3346_v57 = vpop.xlane.xlu2 %3345 }
 0x3db   : > { %v3347_v26 = vsub.f32 %v3340_v27, %v3346_v57 }
 0x3dd   : > { %v3348_v61 = vmul.f32 1.442695, %v3347_v26 }
 0x3df   : > { %3511 = vpow2.f32 %v3348_v61 }
 0x3e5   : > { %v3512_v58 = vpop.eup %3511 }
 0x3e6   : > { %v3350_v46 = vsel %vm3342_vm15, %v3512_v58, 0.0 }
 0x3e7   : > { %3351 = vadd.xlane.f32.xlu2 %v3350_v46 }
 0x45a   : > { %v3352_v19 = vpop.xlane.xlu2 %3351 }
 0x45b   : > { %3513 = vlog2.f32 %v3352_v19 }
 0x461   : > { %v3514_v30 = vpop.eup %3513 }
 0x462   : > { %v3354_v53 = vmul.f32 0.6931472, %v3514_v30 }
 0x464   : > { %v3355_v16 = vsub.f32 %v3347_v26, %v3354_v53 }
 0x466   : > { %3356 = vst.msk [vmem:[%s353_s21] sm:$0x3f] %vm3342_vm15, %v3355_v16 }
 0x467 PF: > { %s20_s30 = sadd.s32 1, %s3521_s30  }
 0x468   : > { %p17_p4 = scmp.ge.s32.totalorder %s20_s30, 4  }
 0x46a   :  { %19 = sbr.rel (!%p17_p4) target bundleno = 1 (0x1), region = 102 }

</bundles_post_ra>
